<compile_context>
chip_gen: v7x
topology: tpu7x:2x2x1
jax: 0.10.0
libtpu: 0.0.40
codegen_flags: <defaults>
</compile_context>

<pallas_src>
import numpy as np

import jax
import jax.numpy as jnp
from jax import lax
from jax.experimental import pallas as pl
from jax.experimental.pallas import tpu as pltpu

# ----------------------------- config (small) -------------------------------
B = 2             # batch
N = 8             # sequence length
INPUT_DIM = 16    # config.encoder.input_dim
HIDDEN = 32       # config.decoder.hidden_dim
NUM_HEADS = 4     # config.decoder.num_heads
HEAD_DIM = HIDDEN // NUM_HEADS
COND_DIM = 32     # config.decoder.conditioning_dim
DEPTH = 2         # config.decoder.depth
Z_SCALES = [2, 4] # config.encoder.z_scales
Z_DIM = 4         # config.encoder.z_dim
FREQ_DIM = 256    # TimestepEmbedder frequency_embedding_size
MLP_RATIO = 4
BN = B * N
LN_EPS = 1e-5
OUT_PAD = 128     # lane-dense output width (final proj padded 16 -> 128)

# ------------------------- packed-slab layouts -------------------------------
# rowdata slab: (BN, ROWDATA_W) = [cos | sin | c_block0..c_block{D-1} | x | bias]
_OFF_COS = 0
_OFF_SIN = HIDDEN
_OFF_C = 2 * HIDDEN
_OFF_X = 2 * HIDDEN + DEPTH * COND_DIM          # 128 (lane-tile aligned)
_OFF_BIAS = _OFF_X + INPUT_DIM
ROWDATA_W = _OFF_BIAS + BN                      # 160

# vec slab: (VEC_ROWS, 8*HIDDEN); one 1-row vector per row, zero padded.
_VEC_W = 8 * HIDDEN                             # 256
_ROW_IN_B = 0
_ROW_FIN_B = 1
_ROW_FIN_LN = 2
_ROW_HEADMASK = 3                               # NUM_HEADS rows of head masks
_ROW_BLK0 = _ROW_HEADMASK + NUM_HEADS           # per block: ln1, ln2, ada_b, b1, b2
_VEC_ROWS = _ROW_BLK0 + 5 * DEPTH               # 17

# wio slab: rows [0:INPUT_DIM] = in_w (lanes 0:HIDDEN, rest zero),
#           rows [INPUT_DIM:INPUT_DIM+HIDDEN] = final_w padded to OUT_PAD lanes.
_WIO_ROWS = INPUT_DIM + HIDDEN                  # 48

# ---------------------- hoisted module-level constants ----------------------
def _rotary_tables_np(n_tok, head_dim, num_heads):
    inv_freq = 1.0 / (10000.0 ** (np.arange(0, head_dim, 2, dtype=np.float32)
                                  / head_dim))
    pos = np.arange(n_tok, dtype=np.float32)
    freqs = np.outer(pos, inv_freq)                     # (N, hd/2)
    emb = np.concatenate([freqs, freqs], axis=-1)       # (N, hd)
    cos = np.tile(np.cos(emb), (1, num_heads))          # (N, D)
    sin = np.tile(np.sin(emb), (1, num_heads))          # (N, D)
    return cos.astype(np.float32), sin.astype(np.float32)


def _rotate_half_matrix():
    # rotate_half(x) == x @ R with R a signed permutation, block-diag per head.
    hd2 = HEAD_DIM // 2
    rh = np.zeros((HEAD_DIM, HEAD_DIM), np.float32)
    for i in range(hd2):
        rh[i + hd2, i] = -1.0
        rh[i, i + hd2] = 1.0
    return np.kron(np.eye(NUM_HEADS, dtype=np.float32), rh)   # (D, D)


_COS_N, _SIN_N = _rotary_tables_np(N, HEAD_DIM, NUM_HEADS)
COS_ROWS = jnp.asarray(np.tile(_COS_N, (B, 1)))   # (B*N, D), row r -> pos r%N
SIN_ROWS = jnp.asarray(np.tile(_SIN_N, (B, 1)))
ROT_MAT = _rotate_half_matrix()                   # folded into Wqkv at init

_T_HALF = FREQ_DIM // 2
T_FREQS = jnp.asarray(
    np.exp(-np.log(10000.0) * np.arange(_T_HALF, dtype=np.float32) / _T_HALF))


# ----------------------------- fused Pallas kernel ---------------------------
def _layernorm(v, w):
    mu = jnp.mean(v, axis=-1, keepdims=True)
    var = jnp.mean(jnp.square(v - mu), axis=-1, keepdims=True)
    return (v - mu) * lax.rsqrt(var + LN_EPS) * w


_TRANS_B = (((1,), (1,)), ((), ()))   # q @ k^T without an explicit transpose


def _decoder_kernel(rowdata_ref, vec_ref, wio_ref, ada_ref, wqkv_ref,
                    wout_ref, w1_ref, w2_ref, o_ref):
    """Whole decoder forward on a (B*N, D) slab; everything stays in vregs."""
    d = HIDDEN

    rd = rowdata_ref[...]                             # (BN, 160)
    cos = rd[:, _OFF_COS:_OFF_COS + d]                # (BN, D)
    sin = rd[:, _OFF_SIN:_OFF_SIN + d]                # (BN, D)
    x_in = rd[:, _OFF_X:_OFF_X + INPUT_DIM]           # (BN, INPUT_DIM)
    bias = rd[:, _OFF_BIAS:_OFF_BIAS + BN]            # (BN, BN) additive mask

    vec = vec_ref[...]                                # (17, 256)
    in_b = vec[_ROW_IN_B:_ROW_IN_B + 1, :d]
    final_b = vec[_ROW_FIN_B:_ROW_FIN_B + 1, :OUT_PAD]
    final_ln_w = vec[_ROW_FIN_LN:_ROW_FIN_LN + 1, :d]
    hmask = [vec[_ROW_HEADMASK + hh:_ROW_HEADMASK + hh + 1, :d]
             for hh in range(NUM_HEADS)]              # (1, D) 0/1 head masks

    wio = wio_ref[...]                                # (48, 128)
    in_w = wio[0:INPUT_DIM, 0:d]                      # (INPUT_DIM, D)
    final_w = wio[INPUT_DIM:INPUT_DIM + d, :]         # (D, OUT_PAD)

    # ---- input projection ----
    h = jnp.dot(x_in, in_w, preferred_element_type=jnp.float32) + in_b

    shift_f = scale_f = None
    for d_i in range(DEPTH):                          # static unroll (DEPTH=2)
        base = _ROW_BLK0 + 5 * d_i
        ln1_w = vec[base + 0:base + 1, :d]
        ln2_w = vec[base + 1:base + 2, :d]
        ada_b = vec[base + 2:base + 3, :8 * d]
        b1 = vec[base + 3:base + 4, :MLP_RATIO * d]
        b2 = vec[base + 4:base + 5, :d]

        # adaLN modulation; last block's matmul also yields the final layer's
        # shift/scale (final adaLN fused into columns 6D:8D).
        c = rd[:, _OFF_C + d_i * COND_DIM:_OFF_C + (d_i + 1) * COND_DIM]
        mod = jnp.dot(c, ada_ref[d_i],
                      preferred_element_type=jnp.float32) + ada_b    # (BN, 8D)
        shift_msa = mod[:, 0 * d:1 * d]
        scale_msa = mod[:, 1 * d:2 * d]
        gate_msa = mod[:, 2 * d:3 * d]

        # ---- attention branch ----
        xm = _layernorm(h, ln1_w) * (1.0 + scale_msa) + shift_msa
        # Extended QKV columns: [Wq*s | Wk | Wv | (Wq*s)@R | Wk@R]; softmax
        # scale and rotate-half are both folded in at init time.
        qkv = jnp.dot(xm, wqkv_ref[d_i],
                      preferred_element_type=jnp.float32)            # (BN, 5D)
        q = qkv[:, 0 * d:1 * d] * cos + qkv[:, 3 * d:4 * d] * sin
        k = qkv[:, 1 * d:2 * d] * cos + qkv[:, 4 * d:5 * d] * sin
        v = qkv[:, 2 * d:3 * d]

        # Per-head attention with head-mask multiplies; the accumulated result
        # is already in concatenated-head layout so Wout is ONE matmul.
        oh_all = jnp.zeros_like(h)
        for hh in range(NUM_HEADS):
            s = lax.dot_general(q * hmask[hh], k, _TRANS_B,
                                preferred_element_type=jnp.float32) + bias
            s = s - jnp.max(s, axis=-1, keepdims=True)
            p = jnp.exp(s)
            p = p / jnp.sum(p, axis=-1, keepdims=True)
            oh_all = oh_all + jnp.dot(p, v * hmask[hh],
                                      preferred_element_type=jnp.float32)
        attn = jnp.dot(oh_all, wout_ref[d_i],
                       preferred_element_type=jnp.float32)
        h = h + gate_msa * attn                       # bias_dropout_scale (eval)

        # ---- MLP branch (slices deferred until needed) ----
        shift_mlp = mod[:, 3 * d:4 * d]
        scale_mlp = mod[:, 4 * d:5 * d]
        gate_mlp = mod[:, 5 * d:6 * d]
        xm2 = _layernorm(h, ln2_w) * (1.0 + scale_mlp) + shift_mlp
        m1 = jnp.dot(xm2, w1_ref[d_i], preferred_element_type=jnp.float32) + b1
        m1 = jax.nn.gelu(m1, approximate=True)        # GELU(tanh)
        h = h + gate_mlp * (jnp.dot(m1, w2_ref[d_i],
                                    preferred_element_type=jnp.float32) + b2)

        if d_i == DEPTH - 1:                          # fused final adaLN chunks
            shift_f = mod[:, 6 * d:7 * d]
            scale_f = mod[:, 7 * d:8 * d]

    # ---- final adaLN layer (conditioned on the LAST block's c, as in ref) ----
    xm = _layernorm(h, final_ln_w) * (1.0 + scale_f) + shift_f
    o_ref[...] = jnp.dot(xm, final_w,
                         preferred_element_type=jnp.float32) + final_b


# ------------------------------ JAX wrapper ----------------------------------
def decoder_forward(params, x, t, latents, attn_mask):
    bsz, n_tok, in_dim = x.shape
    # rotary tables / bias layout are baked for (B, N, INPUT_DIM) at import.
    assert (bsz, n_tok, in_dim) == (B, N, INPUT_DIM), (bsz, n_tok, in_dim)
    assert attn_mask.shape == (B, N), attn_mask.shape

    # ---- conditioning path: a few (B, .)-sized XLA ops fused by jit ----
    args = t[:, None].astype(jnp.float32) * T_FREQS[None, :]
    t_freq = jnp.concatenate([jnp.cos(args), jnp.sin(args)], axis=-1)  # (B, 256)
    th = jax.nn.silu(t_freq @ params["t_w1"] + params["t_b1"])
    t_emb = th @ params["t_w2"] + params["t_b2"]                       # (B, C)

    c_rows = []
    for i in range(DEPTH):
        set_emb = latents[i] @ params["emb_w"][i] + params["emb_b"][i]
        c = jax.nn.silu(t_emb + set_emb)                               # (B, C)
        c_rows.append(jnp.repeat(c, n_tok, axis=0))                    # (BN, C)

    # ---- additive attention bias: block-diagonal over batch + key padding ----
    batch_ids = jnp.repeat(jnp.arange(bsz), n_tok)                     # (BN,)
    same_batch = batch_ids[:, None] == batch_ids[None, :]
    keep_key = attn_mask.reshape(bsz * n_tok)
    bias = jnp.where(same_batch & keep_key[None, :], 0.0, -1e9).astype(jnp.float32)

    # ---- single per-row data slab (one DMA instead of five) ----
    rowdata = jnp.concatenate(
        [COS_ROWS, SIN_ROWS] + c_rows
        + [x.reshape(BN, INPUT_DIM).astype(jnp.float32), bias], axis=-1)

    mu_flat = pl.pallas_call(
        _decoder_kernel,
        out_shape=jax.ShapeDtypeStruct((BN, OUT_PAD), jnp.float32),
        # Honest, small scoped-VMEM request (actual footprint < 0.5 MiB).
        compiler_params=pltpu.CompilerParams(vmem_limit_bytes=8 * 1024 * 1024),
    )(rowdata, params["vec"], params["wio"], params["ada_w"],
      params["wqkv"], params["wout"], params["w1"], params["w2"])

    return mu_flat[:, :INPUT_DIM].reshape(bsz, n_tok, INPUT_DIM)


# ------------------------------ parameters -----------------------------------
def init_params(key):
    keys = iter(jax.random.split(key, 64))
    d = HIDDEN
    rot = jnp.asarray(ROT_MAT)
    att_scale = 1.0 / float(HEAD_DIM) ** 0.5

    def lin(in_d, out_d, scale=0.02):
        w = jax.random.normal(next(keys), (in_d, out_d), jnp.float32) * scale
        bb = jax.random.normal(next(keys), (out_d,), jnp.float32) * scale
        return w, bb

    def pad_row(v):
        return jnp.pad(v.astype(jnp.float32), (0, _VEC_W - v.shape[0]))

    p = {}
    # conditioning path (plain XLA in the wrapper)
    p["t_w1"], p["t_b1"] = lin(FREQ_DIM, COND_DIM)
    p["t_w2"], p["t_b2"] = lin(COND_DIM, COND_DIM)
    p["emb_w"], p["emb_b"] = [], []
    for zs in Z_SCALES:
        w, bb = lin(Z_DIM * zs, COND_DIM)
        p["emb_w"].append(w)
        p["emb_b"].append(bb)

    in_w, in_b = lin(INPUT_DIM, d)
    final_w, final_b = lin(d, INPUT_DIM)
    final_ada_w, final_ada_b = lin(COND_DIM, 2 * d)
    final_ln_w = jnp.ones((d,), jnp.float32)

    vec_rows = [None] * _VEC_ROWS
    vec_rows[_ROW_IN_B] = pad_row(in_b)
    vec_rows[_ROW_FIN_B] = pad_row(final_b)          # lanes 16..255 are zero
    vec_rows[_ROW_FIN_LN] = pad_row(final_ln_w)
    for hh in range(NUM_HEADS):
        m = np.zeros((d,), np.float32)
        m[hh * HEAD_DIM:(hh + 1) * HEAD_DIM] = 1.0
        vec_rows[_ROW_HEADMASK + hh] = pad_row(jnp.asarray(m))

    ada_w_all, wqkv_all, wout_all, w1_all, w2_all = [], [], [], [], []
    for d_i in range(DEPTH):
        ln1_w = jnp.ones((d,), jnp.float32)
        ln2_w = jnp.ones((d,), jnp.float32)

        wqkv = jax.random.normal(next(keys), (d, 3 * d), jnp.float32) * 0.02
        wq = wqkv[:, :d] * att_scale                 # softmax scale folded in
        wk = wqkv[:, d:2 * d]
        wv = wqkv[:, 2 * d:]
        # rotate_half folded in: rotate_half(x@Wq) == x@(Wq@R)
        wqkv_all.append(jnp.concatenate([wq, wk, wv, wq @ rot, wk @ rot],
                                        axis=1))     # (D, 5D)

        wout_all.append(jax.random.normal(next(keys), (d, d), jnp.float32) * 0.02)

        w1, b1 = lin(d, MLP_RATIO * d)
        w2, b2 = lin(MLP_RATIO * d, d)
        w1_all.append(w1)
        w2_all.append(w2)

        ada_w, ada_b = lin(COND_DIM, 6 * d)
        if d_i == DEPTH - 1:
            # final adaLN fused into the last block's modulation matmul
            ada_w8 = jnp.concatenate([ada_w, final_ada_w], axis=1)
            ada_b8 = jnp.concatenate([ada_b, final_ada_b], axis=0)
        else:
            ada_w8 = jnp.concatenate(
                [ada_w, jnp.zeros((COND_DIM, 2 * d), jnp.float32)], axis=1)
            ada_b8 = jnp.concatenate([ada_b, jnp.zeros((2 * d,), jnp.float32)],
                                     axis=0)
        ada_w_all.append(ada_w8)

        base = _ROW_BLK0 + 5 * d_i
        vec_rows[base + 0] = pad_row(ln1_w)
        vec_rows[base + 1] = pad_row(ln2_w)
        vec_rows[base + 2] = pad_row(ada_b8)
        vec_rows[base + 3] = pad_row(b1)
        vec_rows[base + 4] = pad_row(b2)

    p["vec"] = jnp.stack(vec_rows, axis=0)           # (17, 256)
    p["ada_w"] = jnp.stack(ada_w_all, axis=0)        # (DEPTH, 32, 256)
    p["wqkv"] = jnp.stack(wqkv_all, axis=0)          # (DEPTH, 32, 160)
    p["wout"] = jnp.stack(wout_all, axis=0)          # (DEPTH, 32, 32)
    p["w1"] = jnp.stack(w1_all, axis=0)              # (DEPTH, 32, 128)
    p["w2"] = jnp.stack(w2_all, axis=0)              # (DEPTH, 128, 32)

    in_w_pad = jnp.pad(in_w, ((0, 0), (0, OUT_PAD - d)))               # (16,128)
    final_w_pad = jnp.pad(final_w, ((0, 0), (0, OUT_PAD - INPUT_DIM)))  # (32,128)
    p["wio"] = jnp.concatenate([in_w_pad, final_w_pad], axis=0)        # (48,128)
    return p


# --------------------------------- main ---------------------------------------
if __name__ == "__main__":
    key = jax.random.PRNGKey(0)
    kp, kx, kt, k0, k1 = jax.random.split(key, 5)

    params = init_params(kp)
    x = jax.random.normal(kx, (B, N, INPUT_DIM), jnp.float32)
    t = jax.random.uniform(kt, (B,), jnp.float32)
    latents = [jax.random.normal(kk, (B, Z_DIM * Z_SCALES[i]), jnp.float32)
               for i, kk in enumerate([k0, k1])]
    # key-padding mask: last 2 tokens of every batch element masked out
    attn_mask = jnp.ones((B, N), dtype=bool).at[:, -2:].set(False)

    fwd = jax.jit(decoder_forward)
    mu = jax.block_until_ready(fwd(params, x, t, latents, attn_mask))
    assert mu.shape == (B, N, INPUT_DIM), mu.shape
    assert bool(jnp.all(jnp.isfinite(mu)))
    print("KERNEL_OK")
</pallas_src>

<mosaic_0001>
module attributes {stable_mosaic.version = 11 : i64} {
  func.func @_decoder_kernel(%arg0: memref<16x160xf32, #tpu.memory_space<vmem>>, %arg1: memref<17x256xf32, #tpu.memory_space<vmem>>, %arg2: memref<48x128xf32, #tpu.memory_space<vmem>>, %arg3: memref<2x32x256xf32, #tpu.memory_space<vmem>>, %arg4: memref<2x32x160xf32, #tpu.memory_space<vmem>>, %arg5: memref<2x32x32xf32, #tpu.memory_space<vmem>>, %arg6: memref<2x32x128xf32, #tpu.memory_space<vmem>>, %arg7: memref<2x128x32xf32, #tpu.memory_space<vmem>>, %arg8: memref<16x128xf32, #tpu.memory_space<vmem>>) attributes {dimension_semantics = [], scalar_prefetch = 0 : i64, scratch_operands = 0 : i64, tpu.core_type = #tpu.core_type<tc>} {
    %c0 = arith.constant 0 : index
    %c0_0 = arith.constant 0 : index
    %0 = vector.load %arg0[%c0, %c0_0] : memref<16x160xf32, #tpu.memory_space<vmem>>, vector<16x160xf32>
    %1 = vector.extract_strided_slice %0 {offsets = [0, 0], sizes = [16, 32], strides = [1, 1]} : vector<16x160xf32> to vector<16x32xf32>
    %2 = vector.extract_strided_slice %0 {offsets = [0, 32], sizes = [16, 32], strides = [1, 1]} : vector<16x160xf32> to vector<16x32xf32>
    %3 = vector.extract_strided_slice %0 {offsets = [0, 128], sizes = [16, 16], strides = [1, 1]} : vector<16x160xf32> to vector<16x16xf32>
    %4 = vector.extract_strided_slice %0 {offsets = [0, 144], sizes = [16, 16], strides = [1, 1]} : vector<16x160xf32> to vector<16x16xf32>
    %c0_1 = arith.constant 0 : index
    %c0_2 = arith.constant 0 : index
    %5 = vector.load %arg1[%c0_1, %c0_2] : memref<17x256xf32, #tpu.memory_space<vmem>>, vector<17x256xf32>
    %6 = vector.extract_strided_slice %5 {offsets = [0, 0], sizes = [1, 32], strides = [1, 1]} : vector<17x256xf32> to vector<1x32xf32>
    %7 = vector.extract_strided_slice %5 {offsets = [1, 0], sizes = [1, 128], strides = [1, 1]} : vector<17x256xf32> to vector<1x128xf32>
    %8 = vector.extract_strided_slice %5 {offsets = [2, 0], sizes = [1, 32], strides = [1, 1]} : vector<17x256xf32> to vector<1x32xf32>
    %9 = vector.extract_strided_slice %5 {offsets = [3, 0], sizes = [1, 32], strides = [1, 1]} : vector<17x256xf32> to vector<1x32xf32>
    %10 = vector.extract_strided_slice %5 {offsets = [4, 0], sizes = [1, 32], strides = [1, 1]} : vector<17x256xf32> to vector<1x32xf32>
    %11 = vector.extract_strided_slice %5 {offsets = [5, 0], sizes = [1, 32], strides = [1, 1]} : vector<17x256xf32> to vector<1x32xf32>
    %12 = vector.extract_strided_slice %5 {offsets = [6, 0], sizes = [1, 32], strides = [1, 1]} : vector<17x256xf32> to vector<1x32xf32>
    %c0_3 = arith.constant 0 : index
    %c0_4 = arith.constant 0 : index
    %13 = vector.load %arg2[%c0_3, %c0_4] : memref<48x128xf32, #tpu.memory_space<vmem>>, vector<48x128xf32>
    %14 = vector.extract_strided_slice %13 {offsets = [0, 0], sizes = [16, 32], strides = [1, 1]} : vector<48x128xf32> to vector<16x32xf32>
    %15 = vector.extract_strided_slice %13 {offsets = [16, 0], sizes = [32, 128], strides = [1, 1]} : vector<48x128xf32> to vector<32x128xf32>
    %cst = arith.constant dense<0.000000e+00> : vector<16x32xf32>
    %16 = tpu.matmul %3, %14, %cst {dimension_numbers = #tpu.dot_dimension_numbers<[1], [0], [0], [1], [0, 0, 1, 1], [], []>} : vector<16x16xf32>, vector<16x32xf32>, vector<16x32xf32> -> vector<16x32xf32>
    %17 = vector.broadcast %6 : vector<1x32xf32> to vector<16x32xf32>
    %18 = arith.addf %16, %17 : vector<16x32xf32>
    %19 = vector.extract_strided_slice %5 {offsets = [7, 0], sizes = [1, 32], strides = [1, 1]} : vector<17x256xf32> to vector<1x32xf32>
    %20 = vector.extract_strided_slice %5 {offsets = [8, 0], sizes = [1, 32], strides = [1, 1]} : vector<17x256xf32> to vector<1x32xf32>
    %21 = vector.extract_strided_slice %5 {offsets = [9, 0], sizes = [1, 256], strides = [1, 1]} : vector<17x256xf32> to vector<1x256xf32>
    %22 = vector.extract_strided_slice %5 {offsets = [10, 0], sizes = [1, 128], strides = [1, 1]} : vector<17x256xf32> to vector<1x128xf32>
    %23 = vector.extract_strided_slice %5 {offsets = [11, 0], sizes = [1, 32], strides = [1, 1]} : vector<17x256xf32> to vector<1x32xf32>
    %24 = vector.extract_strided_slice %0 {offsets = [0, 64], sizes = [16, 32], strides = [1, 1]} : vector<16x160xf32> to vector<16x32xf32>
    %c0_5 = arith.constant 0 : index
    %c0_6 = arith.constant 0 : index
    %c0_7 = arith.constant 0 : index
    %25 = vector.load %arg3[%c0_5, %c0_6, %c0_7] : memref<2x32x256xf32, #tpu.memory_space<vmem>>, vector<1x32x256xf32>
    %26 = vector.shape_cast %25 : vector<1x32x256xf32> to vector<32x256xf32>
    %cst_8 = arith.constant dense<0.000000e+00> : vector<16x256xf32>
    %27 = tpu.matmul %24, %26, %cst_8 {dimension_numbers = #tpu.dot_dimension_numbers<[1], [0], [0], [1], [0, 0, 1, 1], [], []>} : vector<16x32xf32>, vector<32x256xf32>, vector<16x256xf32> -> vector<16x256xf32>
    %28 = vector.broadcast %21 : vector<1x256xf32> to vector<16x256xf32>
    %29 = arith.addf %27, %28 : vector<16x256xf32>
    %30 = vector.extract_strided_slice %29 {offsets = [0, 0], sizes = [16, 32], strides = [1, 1]} : vector<16x256xf32> to vector<16x32xf32>
    %31 = vector.extract_strided_slice %29 {offsets = [0, 32], sizes = [16, 32], strides = [1, 1]} : vector<16x256xf32> to vector<16x32xf32>
    %32 = vector.extract_strided_slice %29 {offsets = [0, 64], sizes = [16, 32], strides = [1, 1]} : vector<16x256xf32> to vector<16x32xf32>
    %cst_9 = arith.constant dense<0.000000e+00> : vector<16xf32>
    %33 = vector.multi_reduction <add>, %18, %cst_9 [1] : vector<16x32xf32> to vector<16xf32>
    %34 = vector.shape_cast %33 : vector<16xf32> to vector<16x1xf32>
    %cst_10 = arith.constant 3.200000e+01 : f32
    %35 = vector.broadcast %cst_10 : f32 to vector<16x1xf32>
    %36 = arith.divf %34, %35 : vector<16x1xf32>
    %37 = vector.broadcast %36 : vector<16x1xf32> to vector<16x32xf32>
    %38 = arith.subf %18, %37 : vector<16x32xf32>
    %39 = arith.mulf %38, %38 : vector<16x32xf32>
    %cst_11 = arith.constant dense<0.000000e+00> : vector<16xf32>
    %40 = vector.multi_reduction <add>, %39, %cst_11 [1] : vector<16x32xf32> to vector<16xf32>
    %41 = vector.shape_cast %40 : vector<16xf32> to vector<16x1xf32>
    %cst_12 = arith.constant 3.200000e+01 : f32
    %42 = vector.broadcast %cst_12 : f32 to vector<16x1xf32>
    %43 = arith.divf %41, %42 : vector<16x1xf32>
    %44 = vector.broadcast %36 : vector<16x1xf32> to vector<16x32xf32>
    %45 = arith.subf %18, %44 : vector<16x32xf32>
    %cst_13 = arith.constant 9.99999974E-6 : f32
    %46 = vector.broadcast %cst_13 : f32 to vector<16x1xf32>
    %47 = arith.addf %43, %46 : vector<16x1xf32>
    %48 = math.rsqrt %47 : vector<16x1xf32>
    %49 = vector.broadcast %48 : vector<16x1xf32> to vector<16x32xf32>
    %50 = arith.mulf %45, %49 : vector<16x32xf32>
    %51 = vector.broadcast %19 : vector<1x32xf32> to vector<16x32xf32>
    %52 = arith.mulf %50, %51 : vector<16x32xf32>
    %cst_14 = arith.constant 1.000000e+00 : f32
    %53 = vector.broadcast %cst_14 : f32 to vector<16x32xf32>
    %54 = arith.addf %53, %31 : vector<16x32xf32>
    %55 = arith.mulf %52, %54 : vector<16x32xf32>
    %56 = arith.addf %55, %30 : vector<16x32xf32>
    %c0_15 = arith.constant 0 : index
    %c0_16 = arith.constant 0 : index
    %c0_17 = arith.constant 0 : index
    %57 = vector.load %arg4[%c0_15, %c0_16, %c0_17] : memref<2x32x160xf32, #tpu.memory_space<vmem>>, vector<1x32x160xf32>
    %58 = vector.shape_cast %57 : vector<1x32x160xf32> to vector<32x160xf32>
    %cst_18 = arith.constant dense<0.000000e+00> : vector<16x160xf32>
    %59 = tpu.matmul %56, %58, %cst_18 {dimension_numbers = #tpu.dot_dimension_numbers<[1], [0], [0], [1], [0, 0, 1, 1], [], []>} : vector<16x32xf32>, vector<32x160xf32>, vector<16x160xf32> -> vector<16x160xf32>
    %60 = vector.extract_strided_slice %59 {offsets = [0, 0], sizes = [16, 32], strides = [1, 1]} : vector<16x160xf32> to vector<16x32xf32>
    %61 = arith.mulf %60, %1 : vector<16x32xf32>
    %62 = vector.extract_strided_slice %59 {offsets = [0, 96], sizes = [16, 32], strides = [1, 1]} : vector<16x160xf32> to vector<16x32xf32>
    %63 = arith.mulf %62, %2 : vector<16x32xf32>
    %64 = arith.addf %61, %63 : vector<16x32xf32>
    %65 = vector.extract_strided_slice %59 {offsets = [0, 32], sizes = [16, 32], strides = [1, 1]} : vector<16x160xf32> to vector<16x32xf32>
    %66 = arith.mulf %65, %1 : vector<16x32xf32>
    %67 = vector.extract_strided_slice %59 {offsets = [0, 128], sizes = [16, 32], strides = [1, 1]} : vector<16x160xf32> to vector<16x32xf32>
    %68 = arith.mulf %67, %2 : vector<16x32xf32>
    %69 = arith.addf %66, %68 : vector<16x32xf32>
    %70 = vector.extract_strided_slice %59 {offsets = [0, 64], sizes = [16, 32], strides = [1, 1]} : vector<16x160xf32> to vector<16x32xf32>
    %cst_19 = arith.constant 0.000000e+00 : f32
    %71 = vector.broadcast %cst_19 : f32 to vector<16x32xf32>
    %72 = vector.broadcast %9 : vector<1x32xf32> to vector<16x32xf32>
    %73 = arith.mulf %64, %72 : vector<16x32xf32>
    %cst_20 = arith.constant dense<0.000000e+00> : vector<16x16xf32>
    %74 = tpu.matmul %73, %69, %cst_20 {dimension_numbers = #tpu.dot_dimension_numbers<[1], [1], [0], [0], [0, 0, 1, 0], [], []>} : vector<16x32xf32>, vector<16x32xf32>, vector<16x16xf32> -> vector<16x16xf32>
    %75 = arith.addf %74, %4 : vector<16x16xf32>
    %cst_21 = arith.constant dense<0xFF800000> : vector<16xf32>
    %76 = vector.multi_reduction <maximumf>, %75, %cst_21 [1] : vector<16x16xf32> to vector<16xf32>
    %77 = vector.shape_cast %76 : vector<16xf32> to vector<16x1xf32>
    %78 = vector.broadcast %77 : vector<16x1xf32> to vector<16x16xf32>
    %79 = arith.subf %75, %78 : vector<16x16xf32>
    %80 = math.exp %79 : vector<16x16xf32>
    %cst_22 = arith.constant dense<0.000000e+00> : vector<16xf32>
    %81 = vector.multi_reduction <add>, %80, %cst_22 [1] : vector<16x16xf32> to vector<16xf32>
    %82 = vector.shape_cast %81 : vector<16xf32> to vector<16x1xf32>
    %83 = vector.broadcast %82 : vector<16x1xf32> to vector<16x16xf32>
    %84 = arith.divf %80, %83 : vector<16x16xf32>
    %85 = vector.broadcast %9 : vector<1x32xf32> to vector<16x32xf32>
    %86 = arith.mulf %70, %85 : vector<16x32xf32>
    %cst_23 = arith.constant dense<0.000000e+00> : vector<16x32xf32>
    %87 = tpu.matmul %84, %86, %cst_23 {dimension_numbers = #tpu.dot_dimension_numbers<[1], [0], [0], [1], [0, 0, 1, 1], [], []>} : vector<16x16xf32>, vector<16x32xf32>, vector<16x32xf32> -> vector<16x32xf32>
    %88 = arith.addf %71, %87 : vector<16x32xf32>
    %89 = vector.broadcast %10 : vector<1x32xf32> to vector<16x32xf32>
    %90 = arith.mulf %64, %89 : vector<16x32xf32>
    %cst_24 = arith.constant dense<0.000000e+00> : vector<16x16xf32>
    %91 = tpu.matmul %90, %69, %cst_24 {dimension_numbers = #tpu.dot_dimension_numbers<[1], [1], [0], [0], [0, 0, 1, 0], [], []>} : vector<16x32xf32>, vector<16x32xf32>, vector<16x16xf32> -> vector<16x16xf32>
    %92 = arith.addf %91, %4 : vector<16x16xf32>
    %cst_25 = arith.constant dense<0xFF800000> : vector<16xf32>
    %93 = vector.multi_reduction <maximumf>, %92, %cst_25 [1] : vector<16x16xf32> to vector<16xf32>
    %94 = vector.shape_cast %93 : vector<16xf32> to vector<16x1xf32>
    %95 = vector.broadcast %94 : vector<16x1xf32> to vector<16x16xf32>
    %96 = arith.subf %92, %95 : vector<16x16xf32>
    %97 = math.exp %96 : vector<16x16xf32>
    %cst_26 = arith.constant dense<0.000000e+00> : vector<16xf32>
    %98 = vector.multi_reduction <add>, %97, %cst_26 [1] : vector<16x16xf32> to vector<16xf32>
    %99 = vector.shape_cast %98 : vector<16xf32> to vector<16x1xf32>
    %100 = vector.broadcast %99 : vector<16x1xf32> to vector<16x16xf32>
    %101 = arith.divf %97, %100 : vector<16x16xf32>
    %102 = vector.broadcast %10 : vector<1x32xf32> to vector<16x32xf32>
    %103 = arith.mulf %70, %102 : vector<16x32xf32>
    %cst_27 = arith.constant dense<0.000000e+00> : vector<16x32xf32>
    %104 = tpu.matmul %101, %103, %cst_27 {dimension_numbers = #tpu.dot_dimension_numbers<[1], [0], [0], [1], [0, 0, 1, 1], [], []>} : vector<16x16xf32>, vector<16x32xf32>, vector<16x32xf32> -> vector<16x32xf32>
    %105 = arith.addf %88, %104 : vector<16x32xf32>
    %106 = vector.broadcast %11 : vector<1x32xf32> to vector<16x32xf32>
    %107 = arith.mulf %64, %106 : vector<16x32xf32>
    %cst_28 = arith.constant dense<0.000000e+00> : vector<16x16xf32>
    %108 = tpu.matmul %107, %69, %cst_28 {dimension_numbers = #tpu.dot_dimension_numbers<[1], [1], [0], [0], [0, 0, 1, 0], [], []>} : vector<16x32xf32>, vector<16x32xf32>, vector<16x16xf32> -> vector<16x16xf32>
    %109 = arith.addf %108, %4 : vector<16x16xf32>
    %cst_29 = arith.constant dense<0xFF800000> : vector<16xf32>
    %110 = vector.multi_reduction <maximumf>, %109, %cst_29 [1] : vector<16x16xf32> to vector<16xf32>
    %111 = vector.shape_cast %110 : vector<16xf32> to vector<16x1xf32>
    %112 = vector.broadcast %111 : vector<16x1xf32> to vector<16x16xf32>
    %113 = arith.subf %109, %112 : vector<16x16xf32>
    %114 = math.exp %113 : vector<16x16xf32>
    %cst_30 = arith.constant dense<0.000000e+00> : vector<16xf32>
    %115 = vector.multi_reduction <add>, %114, %cst_30 [1] : vector<16x16xf32> to vector<16xf32>
    %116 = vector.shape_cast %115 : vector<16xf32> to vector<16x1xf32>
    %117 = vector.broadcast %116 : vector<16x1xf32> to vector<16x16xf32>
    %118 = arith.divf %114, %117 : vector<16x16xf32>
    %119 = vector.broadcast %11 : vector<1x32xf32> to vector<16x32xf32>
    %120 = arith.mulf %70, %119 : vector<16x32xf32>
    %cst_31 = arith.constant dense<0.000000e+00> : vector<16x32xf32>
    %121 = tpu.matmul %118, %120, %cst_31 {dimension_numbers = #tpu.dot_dimension_numbers<[1], [0], [0], [1], [0, 0, 1, 1], [], []>} : vector<16x16xf32>, vector<16x32xf32>, vector<16x32xf32> -> vector<16x32xf32>
    %122 = arith.addf %105, %121 : vector<16x32xf32>
    %123 = vector.broadcast %12 : vector<1x32xf32> to vector<16x32xf32>
    %124 = arith.mulf %64, %123 : vector<16x32xf32>
    %cst_32 = arith.constant dense<0.000000e+00> : vector<16x16xf32>
    %125 = tpu.matmul %124, %69, %cst_32 {dimension_numbers = #tpu.dot_dimension_numbers<[1], [1], [0], [0], [0, 0, 1, 0], [], []>} : vector<16x32xf32>, vector<16x32xf32>, vector<16x16xf32> -> vector<16x16xf32>
    %126 = arith.addf %125, %4 : vector<16x16xf32>
    %cst_33 = arith.constant dense<0xFF800000> : vector<16xf32>
    %127 = vector.multi_reduction <maximumf>, %126, %cst_33 [1] : vector<16x16xf32> to vector<16xf32>
    %128 = vector.shape_cast %127 : vector<16xf32> to vector<16x1xf32>
    %129 = vector.broadcast %128 : vector<16x1xf32> to vector<16x16xf32>
    %130 = arith.subf %126, %129 : vector<16x16xf32>
    %131 = math.exp %130 : vector<16x16xf32>
    %cst_34 = arith.constant dense<0.000000e+00> : vector<16xf32>
    %132 = vector.multi_reduction <add>, %131, %cst_34 [1] : vector<16x16xf32> to vector<16xf32>
    %133 = vector.shape_cast %132 : vector<16xf32> to vector<16x1xf32>
    %134 = vector.broadcast %133 : vector<16x1xf32> to vector<16x16xf32>
    %135 = arith.divf %131, %134 : vector<16x16xf32>
    %136 = vector.broadcast %12 : vector<1x32xf32> to vector<16x32xf32>
    %137 = arith.mulf %70, %136 : vector<16x32xf32>
    %cst_35 = arith.constant dense<0.000000e+00> : vector<16x32xf32>
    %138 = tpu.matmul %135, %137, %cst_35 {dimension_numbers = #tpu.dot_dimension_numbers<[1], [0], [0], [1], [0, 0, 1, 1], [], []>} : vector<16x16xf32>, vector<16x32xf32>, vector<16x32xf32> -> vector<16x32xf32>
    %139 = arith.addf %122, %138 : vector<16x32xf32>
    %c0_36 = arith.constant 0 : index
    %c0_37 = arith.constant 0 : index
    %c0_38 = arith.constant 0 : index
    %140 = vector.load %arg5[%c0_36, %c0_37, %c0_38] : memref<2x32x32xf32, #tpu.memory_space<vmem>>, vector<1x32x32xf32>
    %141 = vector.shape_cast %140 : vector<1x32x32xf32> to vector<32x32xf32>
    %cst_39 = arith.constant dense<0.000000e+00> : vector<16x32xf32>
    %142 = tpu.matmul %139, %141, %cst_39 {dimension_numbers = #tpu.dot_dimension_numbers<[1], [0], [0], [1], [0, 0, 1, 1], [], []>} : vector<16x32xf32>, vector<32x32xf32>, vector<16x32xf32> -> vector<16x32xf32>
    %143 = arith.mulf %32, %142 : vector<16x32xf32>
    %144 = arith.addf %18, %143 : vector<16x32xf32>
    %145 = vector.extract_strided_slice %29 {offsets = [0, 96], sizes = [16, 32], strides = [1, 1]} : vector<16x256xf32> to vector<16x32xf32>
    %146 = vector.extract_strided_slice %29 {offsets = [0, 128], sizes = [16, 32], strides = [1, 1]} : vector<16x256xf32> to vector<16x32xf32>
    %147 = vector.extract_strided_slice %29 {offsets = [0, 160], sizes = [16, 32], strides = [1, 1]} : vector<16x256xf32> to vector<16x32xf32>
    %cst_40 = arith.constant dense<0.000000e+00> : vector<16xf32>
    %148 = vector.multi_reduction <add>, %144, %cst_40 [1] : vector<16x32xf32> to vector<16xf32>
    %149 = vector.shape_cast %148 : vector<16xf32> to vector<16x1xf32>
    %cst_41 = arith.constant 3.200000e+01 : f32
    %150 = vector.broadcast %cst_41 : f32 to vector<16x1xf32>
    %151 = arith.divf %149, %150 : vector<16x1xf32>
    %152 = vector.broadcast %151 : vector<16x1xf32> to vector<16x32xf32>
    %153 = arith.subf %144, %152 : vector<16x32xf32>
    %154 = arith.mulf %153, %153 : vector<16x32xf32>
    %cst_42 = arith.constant dense<0.000000e+00> : vector<16xf32>
    %155 = vector.multi_reduction <add>, %154, %cst_42 [1] : vector<16x32xf32> to vector<16xf32>
    %156 = vector.shape_cast %155 : vector<16xf32> to vector<16x1xf32>
    %cst_43 = arith.constant 3.200000e+01 : f32
    %157 = vector.broadcast %cst_43 : f32 to vector<16x1xf32>
    %158 = arith.divf %156, %157 : vector<16x1xf32>
    %159 = vector.broadcast %151 : vector<16x1xf32> to vector<16x32xf32>
    %160 = arith.subf %144, %159 : vector<16x32xf32>
    %cst_44 = arith.constant 9.99999974E-6 : f32
    %161 = vector.broadcast %cst_44 : f32 to vector<16x1xf32>
    %162 = arith.addf %158, %161 : vector<16x1xf32>
    %163 = math.rsqrt %162 : vector<16x1xf32>
    %164 = vector.broadcast %163 : vector<16x1xf32> to vector<16x32xf32>
    %165 = arith.mulf %160, %164 : vector<16x32xf32>
    %166 = vector.broadcast %20 : vector<1x32xf32> to vector<16x32xf32>
    %167 = arith.mulf %165, %166 : vector<16x32xf32>
    %cst_45 = arith.constant 1.000000e+00 : f32
    %168 = vector.broadcast %cst_45 : f32 to vector<16x32xf32>
    %169 = arith.addf %168, %146 : vector<16x32xf32>
    %170 = arith.mulf %167, %169 : vector<16x32xf32>
    %171 = arith.addf %170, %145 : vector<16x32xf32>
    %c0_46 = arith.constant 0 : index
    %c0_47 = arith.constant 0 : index
    %c0_48 = arith.constant 0 : index
    %172 = vector.load %arg6[%c0_46, %c0_47, %c0_48] : memref<2x32x128xf32, #tpu.memory_space<vmem>>, vector<1x32x128xf32>
    %173 = vector.shape_cast %172 : vector<1x32x128xf32> to vector<32x128xf32>
    %cst_49 = arith.constant dense<0.000000e+00> : vector<16x128xf32>
    %174 = tpu.matmul %171, %173, %cst_49 {dimension_numbers = #tpu.dot_dimension_numbers<[1], [0], [0], [1], [0, 0, 1, 1], [], []>} : vector<16x32xf32>, vector<32x128xf32>, vector<16x128xf32> -> vector<16x128xf32>
    %175 = vector.broadcast %22 : vector<1x128xf32> to vector<16x128xf32>
    %176 = arith.addf %174, %175 : vector<16x128xf32>
    %177 = arith.mulf %176, %176 : vector<16x128xf32>
    %178 = arith.mulf %176, %177 : vector<16x128xf32>
    %cst_50 = arith.constant 4.471500e-02 : f32
    %179 = vector.broadcast %cst_50 : f32 to vector<16x128xf32>
    %180 = arith.mulf %179, %178 : vector<16x128xf32>
    %181 = arith.addf %176, %180 : vector<16x128xf32>
    %cst_51 = arith.constant 0.797884583 : f32
    %182 = vector.broadcast %cst_51 : f32 to vector<16x128xf32>
    %183 = arith.mulf %182, %181 : vector<16x128xf32>
    %184 = math.tanh %183 : vector<16x128xf32>
    %cst_52 = arith.constant 1.000000e+00 : f32
    %185 = vector.broadcast %cst_52 : f32 to vector<16x128xf32>
    %186 = arith.addf %185, %184 : vector<16x128xf32>
    %cst_53 = arith.constant 5.000000e-01 : f32
    %187 = vector.broadcast %cst_53 : f32 to vector<16x128xf32>
    %188 = arith.mulf %187, %186 : vector<16x128xf32>
    %189 = arith.mulf %176, %188 : vector<16x128xf32>
    %c0_54 = arith.constant 0 : index
    %c0_55 = arith.constant 0 : index
    %c0_56 = arith.constant 0 : index
    %190 = vector.load %arg7[%c0_54, %c0_55, %c0_56] : memref<2x128x32xf32, #tpu.memory_space<vmem>>, vector<1x128x32xf32>
    %191 = vector.shape_cast %190 : vector<1x128x32xf32> to vector<128x32xf32>
    %cst_57 = arith.constant dense<0.000000e+00> : vector<16x32xf32>
    %192 = tpu.matmul %189, %191, %cst_57 {dimension_numbers = #tpu.dot_dimension_numbers<[1], [0], [0], [1], [0, 0, 1, 1], [], []>} : vector<16x128xf32>, vector<128x32xf32>, vector<16x32xf32> -> vector<16x32xf32>
    %193 = vector.broadcast %23 : vector<1x32xf32> to vector<16x32xf32>
    %194 = arith.addf %192, %193 : vector<16x32xf32>
    %195 = arith.mulf %147, %194 : vector<16x32xf32>
    %196 = arith.addf %144, %195 : vector<16x32xf32>
    %197 = vector.extract_strided_slice %5 {offsets = [12, 0], sizes = [1, 32], strides = [1, 1]} : vector<17x256xf32> to vector<1x32xf32>
    %198 = vector.extract_strided_slice %5 {offsets = [13, 0], sizes = [1, 32], strides = [1, 1]} : vector<17x256xf32> to vector<1x32xf32>
    %199 = vector.extract_strided_slice %5 {offsets = [14, 0], sizes = [1, 256], strides = [1, 1]} : vector<17x256xf32> to vector<1x256xf32>
    %200 = vector.extract_strided_slice %5 {offsets = [15, 0], sizes = [1, 128], strides = [1, 1]} : vector<17x256xf32> to vector<1x128xf32>
    %201 = vector.extract_strided_slice %5 {offsets = [16, 0], sizes = [1, 32], strides = [1, 1]} : vector<17x256xf32> to vector<1x32xf32>
    %202 = vector.extract_strided_slice %0 {offsets = [0, 96], sizes = [16, 32], strides = [1, 1]} : vector<16x160xf32> to vector<16x32xf32>
    %c1 = arith.constant 1 : index
    %c0_58 = arith.constant 0 : index
    %c0_59 = arith.constant 0 : index
    %203 = vector.load %arg3[%c1, %c0_58, %c0_59] : memref<2x32x256xf32, #tpu.memory_space<vmem>>, vector<1x32x256xf32>
    %204 = vector.shape_cast %203 : vector<1x32x256xf32> to vector<32x256xf32>
    %cst_60 = arith.constant dense<0.000000e+00> : vector<16x256xf32>
    %205 = tpu.matmul %202, %204, %cst_60 {dimension_numbers = #tpu.dot_dimension_numbers<[1], [0], [0], [1], [0, 0, 1, 1], [], []>} : vector<16x32xf32>, vector<32x256xf32>, vector<16x256xf32> -> vector<16x256xf32>
    %206 = vector.broadcast %199 : vector<1x256xf32> to vector<16x256xf32>
    %207 = arith.addf %205, %206 : vector<16x256xf32>
    %208 = vector.extract_strided_slice %207 {offsets = [0, 0], sizes = [16, 32], strides = [1, 1]} : vector<16x256xf32> to vector<16x32xf32>
    %209 = vector.extract_strided_slice %207 {offsets = [0, 32], sizes = [16, 32], strides = [1, 1]} : vector<16x256xf32> to vector<16x32xf32>
    %210 = vector.extract_strided_slice %207 {offsets = [0, 64], sizes = [16, 32], strides = [1, 1]} : vector<16x256xf32> to vector<16x32xf32>
    %cst_61 = arith.constant dense<0.000000e+00> : vector<16xf32>
    %211 = vector.multi_reduction <add>, %196, %cst_61 [1] : vector<16x32xf32> to vector<16xf32>
    %212 = vector.shape_cast %211 : vector<16xf32> to vector<16x1xf32>
    %cst_62 = arith.constant 3.200000e+01 : f32
    %213 = vector.broadcast %cst_62 : f32 to vector<16x1xf32>
    %214 = arith.divf %212, %213 : vector<16x1xf32>
    %215 = vector.broadcast %214 : vector<16x1xf32> to vector<16x32xf32>
    %216 = arith.subf %196, %215 : vector<16x32xf32>
    %217 = arith.mulf %216, %216 : vector<16x32xf32>
    %cst_63 = arith.constant dense<0.000000e+00> : vector<16xf32>
    %218 = vector.multi_reduction <add>, %217, %cst_63 [1] : vector<16x32xf32> to vector<16xf32>
    %219 = vector.shape_cast %218 : vector<16xf32> to vector<16x1xf32>
    %cst_64 = arith.constant 3.200000e+01 : f32
    %220 = vector.broadcast %cst_64 : f32 to vector<16x1xf32>
    %221 = arith.divf %219, %220 : vector<16x1xf32>
    %222 = vector.broadcast %214 : vector<16x1xf32> to vector<16x32xf32>
    %223 = arith.subf %196, %222 : vector<16x32xf32>
    %cst_65 = arith.constant 9.99999974E-6 : f32
    %224 = vector.broadcast %cst_65 : f32 to vector<16x1xf32>
    %225 = arith.addf %221, %224 : vector<16x1xf32>
    %226 = math.rsqrt %225 : vector<16x1xf32>
    %227 = vector.broadcast %226 : vector<16x1xf32> to vector<16x32xf32>
    %228 = arith.mulf %223, %227 : vector<16x32xf32>
    %229 = vector.broadcast %197 : vector<1x32xf32> to vector<16x32xf32>
    %230 = arith.mulf %228, %229 : vector<16x32xf32>
    %cst_66 = arith.constant 1.000000e+00 : f32
    %231 = vector.broadcast %cst_66 : f32 to vector<16x32xf32>
    %232 = arith.addf %231, %209 : vector<16x32xf32>
    %233 = arith.mulf %230, %232 : vector<16x32xf32>
    %234 = arith.addf %233, %208 : vector<16x32xf32>
    %c1_67 = arith.constant 1 : index
    %c0_68 = arith.constant 0 : index
    %c0_69 = arith.constant 0 : index
    %235 = vector.load %arg4[%c1_67, %c0_68, %c0_69] : memref<2x32x160xf32, #tpu.memory_space<vmem>>, vector<1x32x160xf32>
    %236 = vector.shape_cast %235 : vector<1x32x160xf32> to vector<32x160xf32>
    %cst_70 = arith.constant dense<0.000000e+00> : vector<16x160xf32>
    %237 = tpu.matmul %234, %236, %cst_70 {dimension_numbers = #tpu.dot_dimension_numbers<[1], [0], [0], [1], [0, 0, 1, 1], [], []>} : vector<16x32xf32>, vector<32x160xf32>, vector<16x160xf32> -> vector<16x160xf32>
    %238 = vector.extract_strided_slice %237 {offsets = [0, 0], sizes = [16, 32], strides = [1, 1]} : vector<16x160xf32> to vector<16x32xf32>
    %239 = arith.mulf %238, %1 : vector<16x32xf32>
    %240 = vector.extract_strided_slice %237 {offsets = [0, 96], sizes = [16, 32], strides = [1, 1]} : vector<16x160xf32> to vector<16x32xf32>
    %241 = arith.mulf %240, %2 : vector<16x32xf32>
    %242 = arith.addf %239, %241 : vector<16x32xf32>
    %243 = vector.extract_strided_slice %237 {offsets = [0, 32], sizes = [16, 32], strides = [1, 1]} : vector<16x160xf32> to vector<16x32xf32>
    %244 = arith.mulf %243, %1 : vector<16x32xf32>
    %245 = vector.extract_strided_slice %237 {offsets = [0, 128], sizes = [16, 32], strides = [1, 1]} : vector<16x160xf32> to vector<16x32xf32>
    %246 = arith.mulf %245, %2 : vector<16x32xf32>
    %247 = arith.addf %244, %246 : vector<16x32xf32>
    %248 = vector.extract_strided_slice %237 {offsets = [0, 64], sizes = [16, 32], strides = [1, 1]} : vector<16x160xf32> to vector<16x32xf32>
    %cst_71 = arith.constant 0.000000e+00 : f32
    %249 = vector.broadcast %cst_71 : f32 to vector<16x32xf32>
    %250 = vector.broadcast %9 : vector<1x32xf32> to vector<16x32xf32>
    %251 = arith.mulf %242, %250 : vector<16x32xf32>
    %cst_72 = arith.constant dense<0.000000e+00> : vector<16x16xf32>
    %252 = tpu.matmul %251, %247, %cst_72 {dimension_numbers = #tpu.dot_dimension_numbers<[1], [1], [0], [0], [0, 0, 1, 0], [], []>} : vector<16x32xf32>, vector<16x32xf32>, vector<16x16xf32> -> vector<16x16xf32>
    %253 = arith.addf %252, %4 : vector<16x16xf32>
    %cst_73 = arith.constant dense<0xFF800000> : vector<16xf32>
    %254 = vector.multi_reduction <maximumf>, %253, %cst_73 [1] : vector<16x16xf32> to vector<16xf32>
    %255 = vector.shape_cast %254 : vector<16xf32> to vector<16x1xf32>
    %256 = vector.broadcast %255 : vector<16x1xf32> to vector<16x16xf32>
    %257 = arith.subf %253, %256 : vector<16x16xf32>
    %258 = math.exp %257 : vector<16x16xf32>
    %cst_74 = arith.constant dense<0.000000e+00> : vector<16xf32>
    %259 = vector.multi_reduction <add>, %258, %cst_74 [1] : vector<16x16xf32> to vector<16xf32>
    %260 = vector.shape_cast %259 : vector<16xf32> to vector<16x1xf32>
    %261 = vector.broadcast %260 : vector<16x1xf32> to vector<16x16xf32>
    %262 = arith.divf %258, %261 : vector<16x16xf32>
    %263 = vector.broadcast %9 : vector<1x32xf32> to vector<16x32xf32>
    %264 = arith.mulf %248, %263 : vector<16x32xf32>
    %cst_75 = arith.constant dense<0.000000e+00> : vector<16x32xf32>
    %265 = tpu.matmul %262, %264, %cst_75 {dimension_numbers = #tpu.dot_dimension_numbers<[1], [0], [0], [1], [0, 0, 1, 1], [], []>} : vector<16x16xf32>, vector<16x32xf32>, vector<16x32xf32> -> vector<16x32xf32>
    %266 = arith.addf %249, %265 : vector<16x32xf32>
    %267 = vector.broadcast %10 : vector<1x32xf32> to vector<16x32xf32>
    %268 = arith.mulf %242, %267 : vector<16x32xf32>
    %cst_76 = arith.constant dense<0.000000e+00> : vector<16x16xf32>
    %269 = tpu.matmul %268, %247, %cst_76 {dimension_numbers = #tpu.dot_dimension_numbers<[1], [1], [0], [0], [0, 0, 1, 0], [], []>} : vector<16x32xf32>, vector<16x32xf32>, vector<16x16xf32> -> vector<16x16xf32>
    %270 = arith.addf %269, %4 : vector<16x16xf32>
    %cst_77 = arith.constant dense<0xFF800000> : vector<16xf32>
    %271 = vector.multi_reduction <maximumf>, %270, %cst_77 [1] : vector<16x16xf32> to vector<16xf32>
    %272 = vector.shape_cast %271 : vector<16xf32> to vector<16x1xf32>
    %273 = vector.broadcast %272 : vector<16x1xf32> to vector<16x16xf32>
    %274 = arith.subf %270, %273 : vector<16x16xf32>
    %275 = math.exp %274 : vector<16x16xf32>
    %cst_78 = arith.constant dense<0.000000e+00> : vector<16xf32>
    %276 = vector.multi_reduction <add>, %275, %cst_78 [1] : vector<16x16xf32> to vector<16xf32>
    %277 = vector.shape_cast %276 : vector<16xf32> to vector<16x1xf32>
    %278 = vector.broadcast %277 : vector<16x1xf32> to vector<16x16xf32>
    %279 = arith.divf %275, %278 : vector<16x16xf32>
    %280 = vector.broadcast %10 : vector<1x32xf32> to vector<16x32xf32>
    %281 = arith.mulf %248, %280 : vector<16x32xf32>
    %cst_79 = arith.constant dense<0.000000e+00> : vector<16x32xf32>
    %282 = tpu.matmul %279, %281, %cst_79 {dimension_numbers = #tpu.dot_dimension_numbers<[1], [0], [0], [1], [0, 0, 1, 1], [], []>} : vector<16x16xf32>, vector<16x32xf32>, vector<16x32xf32> -> vector<16x32xf32>
    %283 = arith.addf %266, %282 : vector<16x32xf32>
    %284 = vector.broadcast %11 : vector<1x32xf32> to vector<16x32xf32>
    %285 = arith.mulf %242, %284 : vector<16x32xf32>
    %cst_80 = arith.constant dense<0.000000e+00> : vector<16x16xf32>
    %286 = tpu.matmul %285, %247, %cst_80 {dimension_numbers = #tpu.dot_dimension_numbers<[1], [1], [0], [0], [0, 0, 1, 0], [], []>} : vector<16x32xf32>, vector<16x32xf32>, vector<16x16xf32> -> vector<16x16xf32>
    %287 = arith.addf %286, %4 : vector<16x16xf32>
    %cst_81 = arith.constant dense<0xFF800000> : vector<16xf32>
    %288 = vector.multi_reduction <maximumf>, %287, %cst_81 [1] : vector<16x16xf32> to vector<16xf32>
    %289 = vector.shape_cast %288 : vector<16xf32> to vector<16x1xf32>
    %290 = vector.broadcast %289 : vector<16x1xf32> to vector<16x16xf32>
    %291 = arith.subf %287, %290 : vector<16x16xf32>
    %292 = math.exp %291 : vector<16x16xf32>
    %cst_82 = arith.constant dense<0.000000e+00> : vector<16xf32>
    %293 = vector.multi_reduction <add>, %292, %cst_82 [1] : vector<16x16xf32> to vector<16xf32>
    %294 = vector.shape_cast %293 : vector<16xf32> to vector<16x1xf32>
    %295 = vector.broadcast %294 : vector<16x1xf32> to vector<16x16xf32>
    %296 = arith.divf %292, %295 : vector<16x16xf32>
    %297 = vector.broadcast %11 : vector<1x32xf32> to vector<16x32xf32>
    %298 = arith.mulf %248, %297 : vector<16x32xf32>
    %cst_83 = arith.constant dense<0.000000e+00> : vector<16x32xf32>
    %299 = tpu.matmul %296, %298, %cst_83 {dimension_numbers = #tpu.dot_dimension_numbers<[1], [0], [0], [1], [0, 0, 1, 1], [], []>} : vector<16x16xf32>, vector<16x32xf32>, vector<16x32xf32> -> vector<16x32xf32>
    %300 = arith.addf %283, %299 : vector<16x32xf32>
    %301 = vector.broadcast %12 : vector<1x32xf32> to vector<16x32xf32>
    %302 = arith.mulf %242, %301 : vector<16x32xf32>
    %cst_84 = arith.constant dense<0.000000e+00> : vector<16x16xf32>
    %303 = tpu.matmul %302, %247, %cst_84 {dimension_numbers = #tpu.dot_dimension_numbers<[1], [1], [0], [0], [0, 0, 1, 0], [], []>} : vector<16x32xf32>, vector<16x32xf32>, vector<16x16xf32> -> vector<16x16xf32>
    %304 = arith.addf %303, %4 : vector<16x16xf32>
    %cst_85 = arith.constant dense<0xFF800000> : vector<16xf32>
    %305 = vector.multi_reduction <maximumf>, %304, %cst_85 [1] : vector<16x16xf32> to vector<16xf32>
    %306 = vector.shape_cast %305 : vector<16xf32> to vector<16x1xf32>
    %307 = vector.broadcast %306 : vector<16x1xf32> to vector<16x16xf32>
    %308 = arith.subf %304, %307 : vector<16x16xf32>
    %309 = math.exp %308 : vector<16x16xf32>
    %cst_86 = arith.constant dense<0.000000e+00> : vector<16xf32>
    %310 = vector.multi_reduction <add>, %309, %cst_86 [1] : vector<16x16xf32> to vector<16xf32>
    %311 = vector.shape_cast %310 : vector<16xf32> to vector<16x1xf32>
    %312 = vector.broadcast %311 : vector<16x1xf32> to vector<16x16xf32>
    %313 = arith.divf %309, %312 : vector<16x16xf32>
    %314 = vector.broadcast %12 : vector<1x32xf32> to vector<16x32xf32>
    %315 = arith.mulf %248, %314 : vector<16x32xf32>
    %cst_87 = arith.constant dense<0.000000e+00> : vector<16x32xf32>
    %316 = tpu.matmul %313, %315, %cst_87 {dimension_numbers = #tpu.dot_dimension_numbers<[1], [0], [0], [1], [0, 0, 1, 1], [], []>} : vector<16x16xf32>, vector<16x32xf32>, vector<16x32xf32> -> vector<16x32xf32>
    %317 = arith.addf %300, %316 : vector<16x32xf32>
    %c1_88 = arith.constant 1 : index
    %c0_89 = arith.constant 0 : index
    %c0_90 = arith.constant 0 : index
    %318 = vector.load %arg5[%c1_88, %c0_89, %c0_90] : memref<2x32x32xf32, #tpu.memory_space<vmem>>, vector<1x32x32xf32>
    %319 = vector.shape_cast %318 : vector<1x32x32xf32> to vector<32x32xf32>
    %cst_91 = arith.constant dense<0.000000e+00> : vector<16x32xf32>
    %320 = tpu.matmul %317, %319, %cst_91 {dimension_numbers = #tpu.dot_dimension_numbers<[1], [0], [0], [1], [0, 0, 1, 1], [], []>} : vector<16x32xf32>, vector<32x32xf32>, vector<16x32xf32> -> vector<16x32xf32>
    %321 = arith.mulf %210, %320 : vector<16x32xf32>
    %322 = arith.addf %196, %321 : vector<16x32xf32>
    %323 = vector.extract_strided_slice %207 {offsets = [0, 96], sizes = [16, 32], strides = [1, 1]} : vector<16x256xf32> to vector<16x32xf32>
    %324 = vector.extract_strided_slice %207 {offsets = [0, 128], sizes = [16, 32], strides = [1, 1]} : vector<16x256xf32> to vector<16x32xf32>
    %325 = vector.extract_strided_slice %207 {offsets = [0, 160], sizes = [16, 32], strides = [1, 1]} : vector<16x256xf32> to vector<16x32xf32>
    %cst_92 = arith.constant dense<0.000000e+00> : vector<16xf32>
    %326 = vector.multi_reduction <add>, %322, %cst_92 [1] : vector<16x32xf32> to vector<16xf32>
    %327 = vector.shape_cast %326 : vector<16xf32> to vector<16x1xf32>
    %cst_93 = arith.constant 3.200000e+01 : f32
    %328 = vector.broadcast %cst_93 : f32 to vector<16x1xf32>
    %329 = arith.divf %327, %328 : vector<16x1xf32>
    %330 = vector.broadcast %329 : vector<16x1xf32> to vector<16x32xf32>
    %331 = arith.subf %322, %330 : vector<16x32xf32>
    %332 = arith.mulf %331, %331 : vector<16x32xf32>
    %cst_94 = arith.constant dense<0.000000e+00> : vector<16xf32>
    %333 = vector.multi_reduction <add>, %332, %cst_94 [1] : vector<16x32xf32> to vector<16xf32>
    %334 = vector.shape_cast %333 : vector<16xf32> to vector<16x1xf32>
    %cst_95 = arith.constant 3.200000e+01 : f32
    %335 = vector.broadcast %cst_95 : f32 to vector<16x1xf32>
    %336 = arith.divf %334, %335 : vector<16x1xf32>
    %337 = vector.broadcast %329 : vector<16x1xf32> to vector<16x32xf32>
    %338 = arith.subf %322, %337 : vector<16x32xf32>
    %cst_96 = arith.constant 9.99999974E-6 : f32
    %339 = vector.broadcast %cst_96 : f32 to vector<16x1xf32>
    %340 = arith.addf %336, %339 : vector<16x1xf32>
    %341 = math.rsqrt %340 : vector<16x1xf32>
    %342 = vector.broadcast %341 : vector<16x1xf32> to vector<16x32xf32>
    %343 = arith.mulf %338, %342 : vector<16x32xf32>
    %344 = vector.broadcast %198 : vector<1x32xf32> to vector<16x32xf32>
    %345 = arith.mulf %343, %344 : vector<16x32xf32>
    %cst_97 = arith.constant 1.000000e+00 : f32
    %346 = vector.broadcast %cst_97 : f32 to vector<16x32xf32>
    %347 = arith.addf %346, %324 : vector<16x32xf32>
    %348 = arith.mulf %345, %347 : vector<16x32xf32>
    %349 = arith.addf %348, %323 : vector<16x32xf32>
    %c1_98 = arith.constant 1 : index
    %c0_99 = arith.constant 0 : index
    %c0_100 = arith.constant 0 : index
    %350 = vector.load %arg6[%c1_98, %c0_99, %c0_100] : memref<2x32x128xf32, #tpu.memory_space<vmem>>, vector<1x32x128xf32>
    %351 = vector.shape_cast %350 : vector<1x32x128xf32> to vector<32x128xf32>
    %cst_101 = arith.constant dense<0.000000e+00> : vector<16x128xf32>
    %352 = tpu.matmul %349, %351, %cst_101 {dimension_numbers = #tpu.dot_dimension_numbers<[1], [0], [0], [1], [0, 0, 1, 1], [], []>} : vector<16x32xf32>, vector<32x128xf32>, vector<16x128xf32> -> vector<16x128xf32>
    %353 = vector.broadcast %200 : vector<1x128xf32> to vector<16x128xf32>
    %354 = arith.addf %352, %353 : vector<16x128xf32>
    %355 = arith.mulf %354, %354 : vector<16x128xf32>
    %356 = arith.mulf %354, %355 : vector<16x128xf32>
    %cst_102 = arith.constant 4.471500e-02 : f32
    %357 = vector.broadcast %cst_102 : f32 to vector<16x128xf32>
    %358 = arith.mulf %357, %356 : vector<16x128xf32>
    %359 = arith.addf %354, %358 : vector<16x128xf32>
    %cst_103 = arith.constant 0.797884583 : f32
    %360 = vector.broadcast %cst_103 : f32 to vector<16x128xf32>
    %361 = arith.mulf %360, %359 : vector<16x128xf32>
    %362 = math.tanh %361 : vector<16x128xf32>
    %cst_104 = arith.constant 1.000000e+00 : f32
    %363 = vector.broadcast %cst_104 : f32 to vector<16x128xf32>
    %364 = arith.addf %363, %362 : vector<16x128xf32>
    %cst_105 = arith.constant 5.000000e-01 : f32
    %365 = vector.broadcast %cst_105 : f32 to vector<16x128xf32>
    %366 = arith.mulf %365, %364 : vector<16x128xf32>
    %367 = arith.mulf %354, %366 : vector<16x128xf32>
    %c1_106 = arith.constant 1 : index
    %c0_107 = arith.constant 0 : index
    %c0_108 = arith.constant 0 : index
    %368 = vector.load %arg7[%c1_106, %c0_107, %c0_108] : memref<2x128x32xf32, #tpu.memory_space<vmem>>, vector<1x128x32xf32>
    %369 = vector.shape_cast %368 : vector<1x128x32xf32> to vector<128x32xf32>
    %cst_109 = arith.constant dense<0.000000e+00> : vector<16x32xf32>
    %370 = tpu.matmul %367, %369, %cst_109 {dimension_numbers = #tpu.dot_dimension_numbers<[1], [0], [0], [1], [0, 0, 1, 1], [], []>} : vector<16x128xf32>, vector<128x32xf32>, vector<16x32xf32> -> vector<16x32xf32>
    %371 = vector.broadcast %201 : vector<1x32xf32> to vector<16x32xf32>
    %372 = arith.addf %370, %371 : vector<16x32xf32>
    %373 = arith.mulf %325, %372 : vector<16x32xf32>
    %374 = arith.addf %322, %373 : vector<16x32xf32>
    %375 = vector.extract_strided_slice %207 {offsets = [0, 192], sizes = [16, 32], strides = [1, 1]} : vector<16x256xf32> to vector<16x32xf32>
    %376 = vector.extract_strided_slice %207 {offsets = [0, 224], sizes = [16, 32], strides = [1, 1]} : vector<16x256xf32> to vector<16x32xf32>
    %cst_110 = arith.constant dense<0.000000e+00> : vector<16xf32>
    %377 = vector.multi_reduction <add>, %374, %cst_110 [1] : vector<16x32xf32> to vector<16xf32>
    %378 = vector.shape_cast %377 : vector<16xf32> to vector<16x1xf32>
    %cst_111 = arith.constant 3.200000e+01 : f32
    %379 = vector.broadcast %cst_111 : f32 to vector<16x1xf32>
    %380 = arith.divf %378, %379 : vector<16x1xf32>
    %381 = vector.broadcast %380 : vector<16x1xf32> to vector<16x32xf32>
    %382 = arith.subf %374, %381 : vector<16x32xf32>
    %383 = arith.mulf %382, %382 : vector<16x32xf32>
    %cst_112 = arith.constant dense<0.000000e+00> : vector<16xf32>
    %384 = vector.multi_reduction <add>, %383, %cst_112 [1] : vector<16x32xf32> to vector<16xf32>
    %385 = vector.shape_cast %384 : vector<16xf32> to vector<16x1xf32>
    %cst_113 = arith.constant 3.200000e+01 : f32
    %386 = vector.broadcast %cst_113 : f32 to vector<16x1xf32>
    %387 = arith.divf %385, %386 : vector<16x1xf32>
    %388 = vector.broadcast %380 : vector<16x1xf32> to vector<16x32xf32>
    %389 = arith.subf %374, %388 : vector<16x32xf32>
    %cst_114 = arith.constant 9.99999974E-6 : f32
    %390 = vector.broadcast %cst_114 : f32 to vector<16x1xf32>
    %391 = arith.addf %387, %390 : vector<16x1xf32>
    %392 = math.rsqrt %391 : vector<16x1xf32>
    %393 = vector.broadcast %392 : vector<16x1xf32> to vector<16x32xf32>
    %394 = arith.mulf %389, %393 : vector<16x32xf32>
    %395 = vector.broadcast %8 : vector<1x32xf32> to vector<16x32xf32>
    %396 = arith.mulf %394, %395 : vector<16x32xf32>
    %cst_115 = arith.constant 1.000000e+00 : f32
    %397 = vector.broadcast %cst_115 : f32 to vector<16x32xf32>
    %398 = arith.addf %397, %376 : vector<16x32xf32>
    %399 = arith.mulf %396, %398 : vector<16x32xf32>
    %400 = arith.addf %399, %375 : vector<16x32xf32>
    %cst_116 = arith.constant dense<0.000000e+00> : vector<16x128xf32>
    %401 = tpu.matmul %400, %15, %cst_116 {dimension_numbers = #tpu.dot_dimension_numbers<[1], [0], [0], [1], [0, 0, 1, 1], [], []>} : vector<16x32xf32>, vector<32x128xf32>, vector<16x128xf32> -> vector<16x128xf32>
    %402 = vector.broadcast %7 : vector<1x128xf32> to vector<16x128xf32>
    %403 = arith.addf %401, %402 : vector<16x128xf32>
    %c0_117 = arith.constant 0 : index
    %c0_118 = arith.constant 0 : index
    %404 = vector.load %arg8[%c0_117, %c0_118] : memref<16x128xf32, #tpu.memory_space<vmem>>, vector<16x128xf32>
    tpu.vector_store %arg8[%c0_117, %c0_118], %403 {strides = array<i32>} : memref<16x128xf32, #tpu.memory_space<vmem>>, vector<16x128xf32>,
    return
  }
}

</mosaic_0001>

<bundles_post_ra>
// kernel: eq.8
= control target key start
LH: loop header
LB: loop body
LE: loop exit
PB: predicated region body
PF: predicated region fallthrough
CT: control target
= control target key end

     0   :  { %vm7_vm0 = vcmask 64512   ;;  %vm13_vm1 = vcmask 130112   ;;  %s39_s0 = inlined_call_operand.vmem [shape: s32[2,8], index: 0, kind: input, shape index: {}]   ;;  %s40_s1 = inlined_call_operand.vmem [shape: s32[16], index: 1, kind: output, shape index: {}]  }
   0x1   :  { %v4_v0 = vld [vmem:[%s39_s0] sm:$0x3]  ;;  %s22_s0 = smov 8  }
   0x2   :  { %5 = vst [vmem:[#allocation1] sm:$0x3] %v4_v0 }
   0x9   :  { %v10_v1 = vld [vmem:[#allocation1 + $0x1] sm:$0x1]   ;;  %v6_v2 = vld [vmem:[#allocation1] sm:$0x1]  }
   0xa   :  { %11 = vrot.lane.b32.xlu0 %v10_v1, %s22_s0  ;;  %8 = vst.msk [vmem:[#allocation0] sm:$0x1] %vm7_vm0, %v6_v2  }
  0x7c   :  { %v12_v3 = vpop.permute.xlu0 %11  }
  0x7d   :  { %14 = vst.msk [vmem:[#allocation0] sm:$0x1] %vm13_vm1, %v12_v3  }
  0x84   :  { %v18_v4 = vld [vmem:[#allocation0] sm:$0x1] }
  0x85   :  { %20 = vst [vmem:[%s40_s1] sm:$0x1] %v18_v4 }

// kernel: decoder_forward.1
= control target key start
LH: loop header
LB: loop body
LE: loop exit
PB: predicated region body
PF: predicated region fallthrough
CT: control target
= control target key end

     0   :  { %vm47_vm0 = vcmask 130048   ;;  %s4073_s15 = smov 64   ;;  %v4074_v19 = vmov 0.0   ;;  %vm151_vm1 = vcmask 261120   ;;  %v43_v22 = vlaneseq  ;;  %s4075_s17 = smov 96   ;;  %s5017_s2 = inlined_call_operand.vmem [shape: f32[48,128], index: 2, kind: input, shape index: {}]   ;;  %s5018_s0 = inlined_call_operand.vmem [shape: f32[16,160], index: 0, kind: input, shape index: {}]   ;;  %s5019_s3 = inlined_call_operand.vmem [shape: f32[2,32,256], index: 3, kind: input, shape index: {}]   ;;  %s5020_s1 = inlined_call_operand.vmem [shape: f32[17,256], index: 1, kind: input, shape index: {}]   ;;  %s5021_s4 = inlined_call_operand.vmem [shape: f32[2,32,160], index: 4, kind: input, shape index: {}]   ;;  %s5022_s5 = inlined_call_operand.vmem [shape: f32[2,32,32], index: 5, kind: input, shape index: {}]   ;;  %s5023_s6 = inlined_call_operand.vmem [shape: f32[2,32,128], index: 6, kind: input, shape index: {}]   ;;  %s5024_s7 = inlined_call_operand.vmem [shape: f32[2,128,32], index: 7, kind: input, shape index: {}]   ;;  %s5025_s8 = inlined_call_operand.vmem [shape: f32[16,128], index: 8, kind: output, shape index: {}]  }
   0x1   :  { %v37_v0 = vld [vmem:[%s5017_s2] sm:$0xff]  ;;  %v38_v1 = vld [vmem:[%s5017_s2 + $0x8] sm:$0xff]  ;;  %v4144_v5 = vld [vmem:[%s5018_s0 + $0x10] sm:$0xff]  ;;  %s4076_s12 = smov 32   ;;  %s4077_s13 = smov 112  }
   0x2   :  { %v4132_v2 = vld [vmem:[%s5018_s0 + $0x8] sm:$0xff]  ;;  %v3690_v3 = vpack.c.bf16 %v38_v1, %v37_v0  ;;  %v4139_v4 = vld [vmem:[%s5018_s0] sm:$0xff]  ;;  %v132_v7 = vld [vmem:[%s5019_s3 + $0x18] sm:$0xff]  ;;  %v4192_v23 = vshrl.u32 %v43_v22, 7 }
   0x3   :  { %3450 = vmatprep.mubr.msk.f32.mxu0 %vm47_vm0, %v4132_v2  ;;  %147 = vrot.lane.b32.xlu0 %v4139_v4, %s4073_s15  ;;  %v130_v6 = vld [vmem:[%s5019_s3 + $0x8] sm:$0xff]  ;;  %v129_v8 = vld [vmem:[%s5019_s3] sm:$0xff]  ;;  %v131_v10 = vld [vmem:[%s5019_s3 + $0x10] sm:$0xff] }
   0x4   :  { %3691 = vmatprep.subr.bf16.mxu0 %v3690_v3  ;;  %v3694_v9 = vpack.c.bf16 %v132_v7, %v130_v6  ;;  %v134_v11 = vld [vmem:[%s5019_s3 + $0x28] sm:$0xff]  ;;  %v136_v12 = vld [vmem:[%s5019_s3 + $0x38] sm:$0xff]  ;;  %v3696_v14 = vpack.c.bf16 %v131_v10, %v129_v8  ;;  %v133_v16 = vld [vmem:[%s5019_s3 + $0x20] sm:$0xff]  ;;  %v45_v24 = vsub.s32 0, %v4192_v23  ;;  %v4220_v47 = vsub.s32 1, %v4192_v23 }
   0x5   :  { %3693 = vmatpush3.bf16.msra.mxu0 %v3690_v3  ;;  %v4169_v13 = vld [vmem:[%s5018_s0 + $0x18] sm:$0xff]  ;;  %v3698_v15 = vpack.c.bf16 %v136_v12, %v134_v11  ;;  %v135_v17 = vld [vmem:[%s5019_s3 + $0x30] sm:$0xff]  ;;  %v4198_v25 = vld [vmem:[%s5020_s1] sm:$0xff]  ;;  %v262_v11 = vsub.s32 7, %v4192_v23 }
   0x6   :  { %3695 = vmatprep.subr.bf16.mxu0 %v3694_v9  ;;  %v3700_v18 = vpack.c.bf16 %v135_v17, %v133_v16  ;;  %v46_v26 = vrot.slane %v4198_v25, %v45_v24  ;;  %v4225_v48 = vld [vmem:[%s5020_s1 + $0x10] sm:$0xff]  ;;  %v281_v54 = vld [vmem:[%s5021_s4 + $0x8] sm:$0xff]  ;;  %v283_v55 = vld [vmem:[%s5021_s4 + $0x18] sm:$0xff] }
   0x7   :  { %149 = vrot.lane.b32.xlu0 %v4144_v5, %s4073_s15  ;;  %v140_v49 = vrot.slane %v4225_v48, %v4220_v47  ;;  %v280_v56 = vld [vmem:[%s5021_s4] sm:$0xff]  ;;  %v3702_v57 = vpack.c.bf16 %v283_v55, %v281_v54  ;;  %v282_v58 = vld [vmem:[%s5021_s4 + $0x10] sm:$0xff]  ;;  %v285_v60 = vld [vmem:[%s5021_s4 + $0x28] sm:$0xff]  ;;  %v263_v12 = vrot.slane %v4198_v25, %v262_v11 }
   0x8   :  { %3451 = vmatmul.mubr.msk.f32.vlgmr.msra.gmra.mrb[0].mxu0 %vm47_vm0, %v4169_v13  ;;  %v3704_v59 = vpack.c.bf16 %v282_v58, %v280_v56  ;;  %v287_v61 = vld [vmem:[%s5021_s4 + $0x38] sm:$0xff]  ;;  %v284_v63 = vld [vmem:[%s5021_s4 + $0x20] sm:$0xff]  ;;  %v286_v0 = vld [vmem:[%s5021_s4 + $0x30] sm:$0xff] }
   0x9   :  { %3697 = vmatpush1.bf16.msra.mxu0 %v3696_v14  ;;  %220 = vmatprep.mubr.f32.mxu0 %v4074_v19  ;;  %v3706_v62 = vpack.c.bf16 %v287_v61, %v285_v60  ;;  %v3708_v1 = vpack.c.bf16 %v286_v0, %v284_v63  ;;  %v415_v63 = vsub.s32 3, %v4192_v23  ;;  %vm4311_vm2 = vmpackc.low %vm151_vm1, %vm151_vm1 }
   0xa   :  { %3699 = vmatprep.subr.bf16.mxu0 %v3698_v15 }
   0xd   :  { %3701 = vmatpush1.bf16.msra.mxu0 %v3700_v18 }
   0xe   :  { %3703 = vmatprep.subr.bf16.mxu0 %v3702_v57 }
  0x75   :  { %v4182_v20 = vpop.permute.xlu0 %147 }
  0x76   :  { %3205 = vmatmul.mubr.msk.f32.vlgmr.msra.gmra.mrb[2].mxu0 %vm151_vm1, %v4182_v20 }
  0x77   :  { %226 = vmatprep.mubr.f32.mxu0 %v4074_v19  ;;  %3705 = vmatpush1.bf16.msra.mxu0 %v3704_v59  ;;  %v546_v59 = vsub.s32 4, %v4192_v23 }
  0x78   :  { %3707 = vmatprep.subr.bf16.mxu0 %v3706_v62 }
  0x79   :  { %v4187_v21 = vpop.permute.xlu0 %149 }
  0x7a   :  { %3206 = vmatmul.mubr.msk.f32.gmra.mrb[4].mxu0 %vm151_vm1, %v4187_v21 }
  0x7b   :  { %358 = vmatprep.mubr.f32.mxu0 %v4074_v19  ;;  %3709 = vmatpush1.bf16.msra.mxu0 %v3708_v1 }
  0xdb   :  { %v3452_v27 = vpop.f32.mrb[0].mxu0 }
  0xdc   :  { %v120_v28 = vpop.f32.mrb[1].mxu0  ;;  %v4205_v30 = vadd.f32 %v3452_v27, %v46_v26 }
  0xdd   :  { %v4203_v29 = vadd.f32 %v120_v28, %v46_v26 }
  0xde   :  { %v236_v32 = vsel %vm151_vm1, %v4205_v30, 0.0 }
  0xdf   :  { %v233_v31 = vsel %vm151_vm1, %v4203_v29, 0.0 }
  0xe0   :  { %234 = vadd.xlane.f32.xlu1 %v233_v31 }
  0xe4   :  { %237 = vadd.xlane.f32.xlu1 %v236_v32 }
 0x149   :  { %v222_v33 = vpop.f32.mrb[2].mxu0 }
 0x14a   :  { %v4211_v34 = vpop.f32.mrb[3].mxu0  ;;  %v4229_v50 = vadd.f32 %v222_v33, %v140_v49 }
 0x14c   :  { %v266_v52 = vadd.f32 1.0, %v4229_v50 }
 0x14d   :  { %v228_v35 = vpop.f32.mrb[4].mxu0 }
 0x14e   :  { %v4213_v36 = vpop.f32.mrb[5].mxu0  ;;  %v4231_v51 = vadd.f32 %v228_v35, %v140_v49 }
 0x150   :  { %v267_v53 = vadd.f32 1.0, %v4231_v51 }
 0x16d   :  { %v235_v37 = vpop.xlane.xlu1 %234 }
 0x16e   :  { %v240_v38 = vmul.f32 0.03125, %v235_v37 }
 0x170   :  { %v242_v39 = vsub.f32 %v4203_v29, %v240_v38 }
 0x171   :  { %v238_v40 = vpop.xlane.xlu1 %237 }
 0x172   :  { %v241_v41 = vmul.f32 0.03125, %v238_v40  ;;  %v244_v42 = vmul.f32 %v242_v39, %v242_v39 }
 0x174   :  { %v243_v43 = vsub.f32 %v4205_v30, %v241_v41  ;;  %v246_v44 = vsel %vm151_vm1, %v244_v42, 0.0 }
 0x175   :  { %247 = vadd.xlane.f32.xlu0 %v246_v44 }
 0x176   :  { %v245_v45 = vmul.f32 %v243_v43, %v243_v43 }
 0x178   :  { %v249_v46 = vsel %vm151_vm1, %v245_v45, 0.0 }
 0x179   :  { %250 = vadd.xlane.f32.xlu1 %v249_v46 }
 0x18a   :  { %270 = vrot.lane.b32.xlu1 %v266_v52, %s4075_s17 }
 0x18b   :  { %387 = vrot.lane.b32.xlu0 %v4139_v4, %s4076_s12 }
 0x18e   :  { %272 = vrot.lane.b32.xlu1 %v267_v53, %s4075_s17 }
 0x192   :  { %395 = vrot.lane.b32.xlu1 %v4139_v4, %s4075_s17 }
 0x196   :  { %397 = vrot.lane.b32.xlu1 %v4144_v5, %s4075_s17 }
 0x19a   :  { %389 = vrot.lane.b32.xlu1 %v4144_v5, %s4076_s12 }
 0x202   :  { %v248_v3 = vpop.xlane.xlu0 %247 }
 0x203   :  { %v252_v6 = vmul.f32 0.03125, %v248_v3 }
 0x205   :  { %v254_v7 = vadd.f32 1e-05, %v252_v6 }
 0x206   :  { %v251_v8 = vpop.xlane.xlu1 %250  ;;  %v4295_v46 = vpop.permute.xlu0 %387 }
 0x207   :  { %3977 = vrsqrt.f32 %v254_v7  ;;  %v253_v9 = vmul.f32 0.03125, %v251_v8 }
 0x209   :  { %v255_v10 = vadd.f32 1e-05, %v253_v9  ;;  %v839_v9 = vsub.s32 5, %v4192_v23 }
 0x20a   :  { %v271_v15 = vpop.permute.xlu1 %270 }
 0x20b   :  { %3979 = vrsqrt.f32 %v255_v10 }
 0x20e   :  { %v273_v27 = vpop.permute.xlu1 %272 }
 0x211   :  { %v3978_v14 = vpop.eup %3977 }
 0x212   :  { %v258_v16 = vmul.f32 %v3978_v14, %v242_v39  ;;  %v4278_v35 = vpop.permute.xlu1 %395  ;;  %v4347_v14 = vrot.slane %v4198_v25, %v839_v9 }
 0x214   :  { %v264_v17 = vmul.f32 %v263_v12, %v258_v16 }
 0x215   :  { %v3980_v18 = vpop.eup %3979 }
 0x216   :  { %v276_v22 = vmul.f32 %v271_v15, %v264_v17  ;;  %v259_v26 = vmul.f32 %v3980_v18, %v243_v43  ;;  %v4286_v41 = vpop.permute.xlu1 %397  ;;  %v4355_v18 = vsub.s32 6, %v4192_v23 }
 0x218   :  { %v278_v28 = vadd.f32 %v276_v22, %v4229_v50  ;;  %v265_v31 = vmul.f32 %v263_v12, %v259_v26  ;;  %v4364_v22 = vrot.slane %v4198_v25, %v4355_v18 }
 0x21a   :  { %v277_v32 = vmul.f32 %v273_v27, %v265_v31  ;;  %3207 = vmatmul.mubr.msk.f32.vlgmr.msra.gmra.mrb[6].mxu0 %vm151_vm1, %v278_v28  ;;  %v4293_v45 = vpop.permute.xlu1 %389 }
 0x21b   :  { %364 = vmatprep.mubr.f32.mxu0 %v4074_v19 }
 0x21c   :  { %v279_v33 = vadd.f32 %v277_v32, %v4231_v51 }
 0x21e   :  { %3208 = vmatmul.mubr.msk.f32.gmra.mrb[8].mxu0 %vm151_vm1, %v279_v33 }
 0x2ed   :  { %v4280_v37 = vpop.f32.mrb[6].mxu0 }
 0x2ee   :  { %v362_v38 = vpop.f32.mrb[7].mxu0  ;;  %v393_v52 = vmul.f32 %v4295_v46, %v4280_v37  ;;  %v375_v58 = vmul.f32 %v4280_v37, %v4182_v20  ;;  %v371_v3 = vmul.f32 %v4280_v37, %v4139_v4  ;;  %v4331_v4 = vrot.slane %v4198_v25, %v415_v63 }
 0x2ef   :  { %v401_v39 = vmul.f32 %v4278_v35, %v362_v38 }
 0x2f1   :  { %405 = vrot.lane.b32.xlu1 %v401_v39, %s4076_s12  ;;  %v4284_v40 = vpop.f32.mrb[8].mxu0 }
 0x2f2   :  { %v368_v42 = vpop.f32.mrb[9].mxu0  ;;  %v376_v43 = vmul.f32 %v4284_v40, %v4187_v21  ;;  %v394_v53 = vmul.f32 %v4293_v45, %v4284_v40  ;;  %v372_v7 = vmul.f32 %v4284_v40, %v4144_v5 }
 0x2f3   :  { %v402_v44 = vmul.f32 %v4286_v41, %v368_v42 }
 0x2f4   :  { %381 = vrot.lane.b32.xlu0 %v376_v43, %s4076_s12 }
 0x2f5   :  { %407 = vrot.lane.b32.xlu1 %v402_v44, %s4076_s12 }
 0x2f8   :  { %427 = vrot.lane.b32.xlu0 %v4169_v13, %s4077_s13 }
 0x363   :  { %v406_v49 = vpop.permute.xlu1 %405 }
 0x364   :  { %v411_v55 = vadd.f32 %v406_v49, %v393_v52 }
 0x366   :  { %v382_v13 = vpop.permute.xlu0 %381 }
 0x367   :  { %v408_v54 = vpop.permute.xlu1 %407  ;;  %v386_v5 = vadd.f32 %v382_v13, %v372_v7 }
 0x368   :  { %v412_v56 = vadd.f32 %v408_v54, %v394_v53 }
 0x369   :  { %v418_v16 = vmul.f32 %v4331_v4, %v386_v5  ;;  %v842_v26 = vmul.f32 %v4347_v14, %v386_v5  ;;  %v1048_v28 = vmul.f32 %v4364_v22, %v386_v5 }
 0x36a   :  { %v3927_v57 = vpack.i.bf16 %v412_v56, %v411_v55  ;;  %v4374_v31 = vpop.permute.xlu0 %427 }
 0x36c   :  { %3928 = vrot.lane.b32.xlu1 %v3927_v57, %s4075_s17 }
 0x370   :  { %379 = vrot.lane.b32.xlu1 %v375_v58, %s4076_s12 }
 0x374   :  { %425 = vrot.lane.b32.xlu1 %v4132_v2, %s4077_s13  ;;  %v4320_v2 = vrot.slane %v4198_v25, %v546_v59 }
 0x376   :  { %v549_v15 = vmul.f32 %v4320_v2, %v386_v5 }
 0x3de   :  { %v3929_v60 = vpop.permute.xlu1 %3928 }
 0x3df   :  { %v3931_v61 = vunpack.i.h.bf16 %v3929_v60  ;;  %v3930_v62 = vunpack.i.l.bf16 %v3929_v60 }
 0x3e1   :  { %v3710_v1 = vpack.c.bf16 %v3931_v61, %v3930_v62 }
 0x3e2   :  { %v380_v6 = vpop.permute.xlu1 %379 }
 0x3e3   :  { %v385_v8 = vadd.f32 %v380_v6, %v371_v3  ;;  %3712 = vmatprep.subr.msk.bf16.mxu1 %vm4311_vm2, %v3710_v1  ;;  %3718 = vmatprep.subr.msk.bf16.mxu0 %vm4311_vm2, %v3710_v1 }
 0x3e4   :  { %3715 = vmatpush3.bf16.xpose.msk.msra.mxu1 %vm4311_vm2, %v3710_v1  ;;  %3721 = vmatpush3.bf16.xpose.msk.msra.mxu0 %vm4311_vm2, %v3710_v1 }
 0x3e5   :  { %3732 = vmatprep.subr.msk.bf16.mxu0 %vm4311_vm2, %v3710_v1  ;;  %v417_v10 = vmul.f32 %v4331_v4, %v385_v8  ;;  %v548_v12 = vmul.f32 %v4320_v2, %v385_v8  ;;  %v841_v17 = vmul.f32 %v4347_v14, %v385_v8  ;;  %v1047_v27 = vmul.f32 %v4364_v22, %v385_v8 }
 0x3e6   :  { %v4376_v32 = vpop.permute.xlu1 %425 }
 0x3e7   :  { %3457 = vmatprep.mubr.msk.f32.mxu1 %vm151_vm1, %v417_v10  ;;  %3464 = vmatprep.mubr.msk.f32.mxu0 %vm151_vm1, %v548_v12 }
 0x3eb   :  { %3458 = vmatmul.mubr.msk.f32.vlgmr.msra.gmra.mrb[0].mxu1 %vm151_vm1, %v418_v16  ;;  %3465 = vmatmul.mubr.msk.f32.vlgmr.msra.gmra.mrb[10].mxu0 %vm151_vm1, %v549_v15 }
 0x3ec   :  { %3735 = vmatpush3.bf16.xpose.msk.msra.mxu0 %vm4311_vm2, %v3710_v1  ;;  %3485 = vmatprep.mubr.msk.f32.mxu0 %vm151_vm1, %v841_v17 }
 0x3ed   :  { %3742 = vmatprep.subr.msk.bf16.mxu0 %vm4311_vm2, %v3710_v1 }
 0x3f3   :  { %3486 = vmatmul.mubr.msk.f32.vlgmr.msra.gmra.mrb[12].mxu0 %vm151_vm1, %v842_v26 }
 0x3f4   :  { %3745 = vmatpush3.bf16.xpose.msk.msra.mxu0 %vm4311_vm2, %v3710_v1  ;;  %3499 = vmatprep.mubr.msk.f32.mxu0 %vm151_vm1, %v1047_v27 }
 0x3fb   :  { %3500 = vmatmul.mubr.msk.f32.vlgmr.msra.gmra.mrb[14].mxu0 %vm151_vm1, %v1048_v28 }
 0x4be   :  { %v3459_v25 = vpop.f32.mrb[0].mxu1  ;;  %v3466_v33 = vpop.f32.mrb[10].mxu0 }
 0x4bf   :  { %v507_v38 = vpop.f32.mrb[1].mxu1  ;;  %v622_v39 = vpop.f32.mrb[11].mxu0  ;;  %v4379_v42 = vadd.f32 %v3466_v33, %v4374_v31  ;;  %v513_v53 = vadd.f32 %v3459_v25, %v4374_v31 }
 0x4c0   :  { %v623_v43 = vadd.f32 %v622_v39, %v4376_v32  ;;  %v4383_v44 = vadd.f32 %v507_v38, %v4376_v32 }
 0x4c1   :  { %v634_v49 = vsel %vm47_vm0, %v4379_v42, -inf  ;;  %v519_v56 = vsel %vm47_vm0, %v513_v53, -inf }
 0x4c2   :  { %635 = vmax.xlane.f32.xlu0 %v634_v49  ;;  %v631_v52 = vsel %vm47_vm0, %v623_v43, -inf  ;;  %v516_v54 = vsel %vm47_vm0, %v4383_v44, -inf }
 0x4c3   :  { %632 = vmax.xlane.f32.xlu1 %v631_v52 }
 0x4c6   :  { %v3487_v55 = vpop.f32.mrb[12].mxu0  ;;  %517 = vmax.xlane.f32.xlu0 %v516_v54 }
 0x4c7   :  { %v921_v57 = vadd.f32 %v3487_v55, %v4374_v31  ;;  %v915_v58 = vpop.f32.mrb[13].mxu0  ;;  %520 = vmax.xlane.f32.xlu1 %v519_v56 }
 0x4c8   :  { %v4394_v60 = vadd.f32 %v915_v58, %v4376_v32 }
 0x4c9   :  { %v927_v61 = vsel %vm47_vm0, %v921_v57, -inf }
 0x4ca   :  { %v924_v62 = vsel %vm47_vm0, %v4394_v60, -inf }
 0x4cb   :  { %925 = vmax.xlane.f32.xlu0 %v924_v62  ;;  %928 = vmax.xlane.f32.xlu1 %v927_v61 }
 0x4ce   :  { %v3501_v1 = vpop.f32.mrb[14].mxu0 }
 0x4cf   :  { %v1127_v3 = vadd.f32 %v3501_v1, %v4374_v31  ;;  %v1121_v13 = vpop.f32.mrb[15].mxu0 }
 0x4d0   :  { %v1122_v6 = vadd.f32 %v1121_v13, %v4376_v32 }
 0x4d1   :  { %v1133_v7 = vsel %vm47_vm0, %v1127_v3, -inf }
 0x4d2   :  { %1134 = vmax.xlane.f32.xlu1 %v1133_v7  ;;  %v1130_v8 = vsel %vm47_vm0, %v1122_v6, -inf }
 0x4d3   :  { %1131 = vmax.xlane.f32.xlu0 %v1130_v8 }
 0x4e3   :  { %539 = vrot.lane.b32.xlu1 %v4331_v4, %s4073_s15 }
 0x4e7   :  { %947 = vrot.lane.b32.xlu1 %v4347_v14, %s4073_s15 }
 0x4e9   :  { %654 = vrot.lane.b32.xlu0 %v4320_v2, %s4073_s15 }
 0x4ed   :  { %1153 = vrot.lane.b32.xlu0 %v4364_v22, %s4073_s15 }
 0x54f   :  { %v636_v5 = vpop.xlane.xlu0 %635 }
 0x550   :  { %v633_v10 = vpop.xlane.xlu1 %632 }
 0x551   :  { %v637_v12 = vsub.f32 %v623_v43, %v633_v10 }
 0x553   :  { %v518_v17 = vpop.xlane.xlu0 %517  ;;  %v639_v26 = vmul.f32 1.442695, %v637_v12 }
 0x554   :  { %v521_v15 = vpop.xlane.xlu1 %520 }
 0x555   :  { %v523_v16 = vsub.f32 %v513_v53, %v521_v15 }
 0x557   :  { %v526_v27 = vmul.f32 1.442695, %v523_v16 }
 0x558   :  { %v929_v28 = vpop.xlane.xlu1 %928  ;;  %v926_v38 = vpop.xlane.xlu0 %925 }
 0x559   :  { %3981 = vpow2.f32 %v526_v27  ;;  %v931_v25 = vsub.f32 %v921_v57, %v929_v28 }
 0x55a   :  { %3983 = vpow2.f32 %v639_v26 }
 0x55b   :  { %v934_v33 = vmul.f32 1.442695, %v931_v25 }
 0x55d   :  { %3985 = vpow2.f32 %v934_v33 }
 0x55f   :  { %v1135_v39 = vpop.xlane.xlu1 %1134 }
 0x560   :  { %v1137_v49 = vsub.f32 %v1127_v3, %v1135_v39  ;;  %v1132_v52 = vpop.xlane.xlu0 %1131 }
 0x561   :  { %v1136_v54 = vsub.f32 %v1122_v6, %v1132_v52 }
 0x562   :  { %v1140_v55 = vmul.f32 1.442695, %v1137_v49 }
 0x563   :  { %v4411_v56 = vpop.eup %3981  ;;  %v1138_v43 = vmul.f32 1.442695, %v1136_v54  ;;  %v4413_v58 = vpop.permute.xlu1 %539 }
 0x564   :  { %3987 = vpow2.f32 %v1140_v55  ;;  %v542_v53 = vmul.f32 %v4413_v58, %v4280_v37  ;;  %v543_v57 = vmul.f32 %v4413_v58, %v4284_v40  ;;  %v4419_v61 = vpop.permute.xlu0 %654  ;;  %v531_v62 = vsel %vm47_vm0, %v4411_v56, 0.0  ;;  %v3984_v1 = vpop.eup %3983 }
 0x565   :  { %v657_v3 = vmul.f32 %v4419_v61, %v4280_v37  ;;  %v658_v13 = vmul.f32 %v4419_v61, %v4284_v40  ;;  %532 = vadd.xlane.f32.xlu1 %v531_v62  ;;  %3989 = vpow2.f32 %v1138_v43  ;;  %v643_v16 = vsel %vm47_vm0, %v3984_v1, 0.0 }
 0x566   :  { %v3937_v6 = vpack.i.bf16 %v543_v57, %v542_v53  ;;  %v522_v43 = vsub.f32 %v4383_v44, %v518_v17  ;;  %v930_v57 = vsub.f32 %v4394_v60, %v926_v38 }
 0x567   :  { %v4427_v7 = vpop.permute.xlu1 %947  ;;  %v3932_v8 = vpack.i.bf16 %v658_v13, %v657_v3  ;;  %v4436_v26 = vpop.eup %3985 }
 0x568   :  { %v950_v10 = vmul.f32 %v4427_v7, %v4280_v37  ;;  %v951_v12 = vmul.f32 %v4427_v7, %v4284_v40  ;;  %v4433_v15 = vpop.permute.xlu0 %1153  ;;  %v939_v39 = vsel %vm47_vm0, %v4436_v26, 0.0  ;;  %v524_v53 = vmul.f32 1.442695, %v522_v43 }
 0x569   :  { %v1156_v27 = vmul.f32 %v4433_v15, %v4280_v37  ;;  %v1157_v28 = vmul.f32 %v4433_v15, %v4284_v40  ;;  %3933 = vrot.lane.b32.xlu0 %v3932_v8, %s4073_s15  ;;  %644 = vadd.xlane.f32.xlu1 %v643_v16  ;;  %v638_v37 = vsub.f32 %v4379_v42, %v636_v5  ;;  %v932_v62 = vmul.f32 1.442695, %v930_v57 }
 0x56a   :  { %v3942_v25 = vpack.i.bf16 %v951_v12, %v950_v10 }
 0x56b   :  { %v3947_v33 = vpack.i.bf16 %v1157_v28, %v1156_v27  ;;  %v641_v55 = vmul.f32 1.442695, %v638_v37 }
 0x56d   :  { %940 = vadd.xlane.f32.xlu1 %v939_v39  ;;  %3991 = vpow2.f32 %v641_v55 }
 0x56e   :  { %v4445_v49 = vpop.eup %3987  ;;  %3993 = vpow2.f32 %v524_v53 }
 0x56f   :  { %v1145_v52 = vsel %vm47_vm0, %v4445_v49, 0.0  ;;  %v4449_v54 = vpop.eup %3989  ;;  %3995 = vpow2.f32 %v932_v62 }
 0x570   :  { %v1142_v40 = vsel %vm47_vm0, %v4449_v54, 0.0 }
 0x571   :  { %1146 = vadd.xlane.f32.xlu1 %v1145_v52 }
 0x575   :  { %1143 = vadd.xlane.f32.xlu1 %v1142_v40 }
 0x577   :  { %v3992_v3 = vpop.eup %3991 }
 0x578   :  { %v646_v13 = vsel %vm47_vm0, %v3992_v3, 0.0  ;;  %v3994_v42 = vpop.eup %3993 }
 0x579   :  { %v528_v5 = vsel %vm47_vm0, %v3994_v42, 0.0  ;;  %v3996_v8 = vpop.eup %3995 }
 0x57a   :  { %v936_v44 = vsel %vm47_vm0, %v3996_v8, 0.0 }
 0x586   :  { %3938 = vrot.lane.b32.xlu1 %v3937_v6, %s4073_s15 }
 0x588   :  { %647 = vadd.xlane.f32.xlu0 %v646_v13 }
 0x58c   :  { %529 = vadd.xlane.f32.xlu0 %v528_v5 }
 0x590   :  { %937 = vadd.xlane.f32.xlu0 %v936_v44 }
 0x5a6   :  { %3943 = vrot.lane.b32.xlu0 %v3942_v25, %s4073_s15 }
 0x5aa   :  { %3948 = vrot.lane.b32.xlu0 %v3947_v33, %s4073_s15 }
 0x5db   :  { %v3934_v60 = vpop.permute.xlu0 %3933 }
 0x5dc   :  { %v3936_v17 = vunpack.i.h.bf16 %v3934_v60  ;;  %v3935_v38 = vunpack.i.l.bf16 %v3934_v60 }
 0x5de   :  { %v3722_v10 = vpack.c.bf16 %v3936_v17, %v3935_v38 }
 0x5e0   :  { %3723 = vmatprep.subr.bf16.mxu1 %v3722_v10 }
 0x5e1   :  { %3725 = vmatpush3.bf16.msra.mxu1 %v3722_v10 }
 0x5f2   :  { %v533_v6 = vpop.xlane.xlu1 %532 }
 0x5f6   :  { %v645_v12 = vpop.xlane.xlu1 %644 }
 0x5f7   :  { %3997 = vrcp.f32 %v645_v12 }
 0x5fa   :  { %v941_v16 = vpop.xlane.xlu1 %940 }
 0x5fe   :  { %v1147_v27 = vpop.xlane.xlu1 %1146 }
 0x601   :  { %v3998_v28 = vpop.eup %3997 }
 0x602   :  { %v1144_v39 = vpop.xlane.xlu1 %1143  ;;  %v650_v52 = vmul.f32 %v3998_v28, %v3984_v1 }
 0x604   :  { %3471 = vmatprep.mubr.msk.f32.mxu1 %vm47_vm0, %v650_v52 }
 0x606   :  { %v3939_v37 = vpop.permute.xlu1 %3938 }
 0x607   :  { %v3941_v25 = vunpack.i.h.bf16 %v3939_v37  ;;  %v3940_v40 = vunpack.i.l.bf16 %v3939_v37 }
 0x609   :  { %v3726_v33 = vpack.c.bf16 %v3941_v25, %v3940_v40 }
 0x60b   :  { %3727 = vmatprep.subr.bf16.mxu1 %v3726_v33 }
 0x615   :  { %v648_v55 = vpop.xlane.xlu0 %647 }
 0x616   :  { %3999 = vrcp.f32 %v648_v55  ;;  %v1252_v55 = vld [vmem:[%s5022_s5 + $0x18] sm:$0xff] }
 0x619   :  { %v530_v43 = vpop.xlane.xlu0 %529 }
 0x61a   :  { %4001 = vrcp.f32 %v530_v43 }
 0x61b   :  { %4003 = vrcp.f32 %v533_v6 }
 0x61d   :  { %v938_v53 = vpop.xlane.xlu0 %937 }
 0x61e   :  { %4005 = vrcp.f32 %v938_v53 }
 0x61f   :  { %4007 = vrcp.f32 %v941_v16 }
 0x620   :  { %v4000_v57 = vpop.eup %3999  ;;  %4009 = vrcp.f32 %v1144_v39  ;;  %v1250_v39 = vld [vmem:[%s5022_s5 + $0x8] sm:$0xff] }
 0x621   :  { %v652_v62 = vmul.f32 %v4000_v57, %v3992_v3  ;;  %v3944_v13 = vpop.permute.xlu0 %3943  ;;  %4011 = vrcp.f32 %v1147_v27 }
 0x622   :  { %v3946_v5 = vunpack.i.h.bf16 %v3944_v13  ;;  %v3945_v44 = vunpack.i.l.bf16 %v3944_v13 }
 0x623   :  { %3472 = vmatmul.mubr.msk.f32.vlgmr.msra.gmra.mrb[2].mxu1 %vm47_vm0, %v652_v62 }
 0x624   :  { %v4002_v1 = vpop.eup %4001  ;;  %v3736_v60 = vpack.c.bf16 %v3946_v5, %v3945_v44  ;;  %3729 = vmatpush3.bf16.msra.mxu1 %v3726_v33  ;;  %v1251_v33 = vld [vmem:[%s5022_s5 + $0x10] sm:$0xff] }
 0x625   :  { %v3949_v17 = vpop.permute.xlu0 %3948  ;;  %v535_v38 = vmul.f32 %v4002_v1, %v3994_v42  ;;  %v4004_v10 = vpop.eup %4003  ;;  %v1249_v42 = vld [vmem:[%s5022_s5] sm:$0xff]  ;;  %v3754_v43 = vpack.c.bf16 %v1252_v55, %v1251_v33  ;;  %v3240_v33 = vld [vmem:[%s5019_s3 + $0x58] sm:$0xff] }
 0x626   :  { %3737 = vmatprep.subr.bf16.mxu1 %v3736_v60  ;;  %v3951_v12 = vunpack.i.h.bf16 %v3949_v17  ;;  %v3950_v6 = vunpack.i.l.bf16 %v3949_v17  ;;  %v537_v3 = vmul.f32 %v4004_v10, %v4411_v56 }
 0x627   :  { %3478 = vmatprep.mubr.msk.f32.mxu1 %vm47_vm0, %v535_v38 }
 0x628   :  { %v4006_v28 = vpop.eup %4005  ;;  %v3746_v37 = vpack.c.bf16 %v3951_v12, %v3950_v6 }
 0x629   :  { %v943_v52 = vmul.f32 %v4006_v28, %v3996_v8  ;;  %v4008_v16 = vpop.eup %4007  ;;  %v3750_v8 = vpack.c.bf16 %v1250_v39, %v1249_v42 }
 0x62a   :  { %v4010_v25 = vpop.eup %4009  ;;  %v945_v56 = vmul.f32 %v4008_v16, %v4436_v26 }
 0x62b   :  { %3479 = vmatmul.mubr.msk.f32.vlgmr.msra.gmra.mrb[2].mxu1 %vm47_vm0, %v537_v3  ;;  %v1149_v40 = vmul.f32 %v4010_v25, %v4449_v54  ;;  %v4012_v27 = vpop.eup %4011  ;;  %v1400_v25 = vld [vmem:[%s5023_s6] sm:$0xff] }
 0x62c   :  { %3739 = vmatpush3.bf16.msra.mxu1 %v3736_v60  ;;  %3492 = vmatprep.mubr.msk.f32.mxu1 %vm47_vm0, %v943_v52  ;;  %v1151_v26 = vmul.f32 %v4012_v27, %v4445_v49  ;;  %v3238_v27 = vld [vmem:[%s5019_s3 + $0x48] sm:$0xff] }
 0x62d   :  { %3747 = vmatprep.subr.bf16.mxu1 %v3746_v37  ;;  %v3798_v55 = vpack.c.bf16 %v3240_v33, %v3238_v27  ;;  %v1507_v33 = vld [vmem:[%s5024_s7] sm:$0xff] }
 0x633   :  { %3493 = vmatmul.mubr.msk.f32.vlgmr.msra.gmra.mrb[2].mxu1 %vm47_vm0, %v945_v56  ;;  %v1401_v56 = vld [vmem:[%s5023_s6 + $0x8] sm:$0xff] }
 0x634   :  { %3749 = vmatpush3.bf16.msra.mxu1 %v3746_v37  ;;  %3506 = vmatprep.mubr.msk.f32.mxu1 %vm47_vm0, %v1149_v40  ;;  %v1402_v40 = vld [vmem:[%s5023_s6 + $0x10] sm:$0xff] }
 0x635   :  { %3751 = vmatprep.subr.bf16.mxu1 %v3750_v8 }
 0x63b   :  { %3507 = vmatmul.mubr.msk.f32.vlgmr.msra.gmra.mrb[2].mxu1 %vm47_vm0, %v1151_v26 }
 0x63c   :  { %3753 = vmatpush3.bf16.msra.mxu1 %v3750_v8  ;;  %v3758_v8 = vpack.c.bf16 %v1401_v56, %v1400_v25 }
 0x63d   :  { %3755 = vmatprep.subr.bf16.mxu1 %v3754_v43 }
 0x63e   :  { %3759 = vmatprep.subr.bf16.mxu0 %v3758_v8 }
 0x63f   :  { %3761 = vmatpush3.bf16.msra.mxu0 %v3758_v8 }
 0x640   :  { %3757 = vmatpush3.bf16.msra.mxu1 %v3754_v43 }
 0x70e   :  { %v3508_v54 = vpop.f32.mrb[2].mxu1 }
 0x70f   :  { %v1238_v53 = vpop.f32.mrb[3].mxu1 }
 0x710   :  { %3517 = vmatprep.mubr.msk.f32.mxu1 %vm151_vm1, %v1238_v53 }
 0x711   :  { %3518 = vmatmul.mubr.msk.f32.vlgmr.msra.gmra.mrb[4].mxu1 %vm151_vm1, %v3508_v54 }
 0x7e4   :  { %v3519_v57 = vpop.f32.mrb[4].mxu1 }
 0x7e5   :  { %1338 = vrot.lane.b32.xlu0 %v3519_v57, %s4073_s15  ;;  %v1325_v62 = vpop.f32.mrb[5].mxu1 }
 0x7e6   :  { %1336 = vrot.lane.b32.xlu1 %v1325_v62, %s4073_s15 }
 0x857   :  { %v1339_v13 = vpop.permute.xlu0 %1338 }
 0x858   :  { %v1343_v49 = vmul.f32 %v1339_v13, %v4231_v51  ;;  %v1337_v5 = vpop.permute.xlu1 %1336  ;;  %v4533_v13 = vld [vmem:[%s5020_s1 + $0x18] sm:$0xff] }
 0x859   :  { %v1342_v44 = vmul.f32 %v1337_v5, %v4229_v50 }
 0x85a   :  { %1348 = vrot.lane.b32.xlu0 %v1343_v49, %s4073_s15  ;;  %v144_v49 = vrot.slane %v4533_v13, %v4220_v47 }
 0x85b   :  { %1346 = vrot.lane.b32.xlu1 %v1342_v44, %s4073_s15  ;;  %v1383_v44 = vrot.slane %v4225_v48, %v45_v24  ;;  %v3239_v24 = vld [vmem:[%s5019_s3 + $0x50] sm:$0xff] }
 0x85c   :  { %v4538_v5 = vadd.f32 %v4213_v36, %v144_v49  ;;  %v3237_v36 = vld [vmem:[%s5019_s3 + $0x40] sm:$0xff] }
 0x85d   :  { %v3800_v56 = vpack.c.bf16 %v3239_v24, %v3237_v36  ;;  %v1520_v36 = vld [vmem:[%s5024_s7 + $0x68] sm:$0xff] }
 0x8cc   :  { %v1349_v1 = vpop.permute.xlu0 %1348 }
 0x8cd   :  { %v4495_v60 = vadd.f32 %v1349_v1, %v4205_v30  ;;  %v1347_v17 = vpop.permute.xlu1 %1346 }
 0x8ce   :  { %v4498_v38 = vadd.f32 %v1347_v17, %v4203_v29  ;;  %v4544_v17 = vadd.f32 %v4211_v34, %v144_v49 }
 0x8cf   :  { %v1357_v10 = vsel %vm151_vm1, %v4495_v60, 0.0 }
 0x8d0   :  { %1358 = vadd.xlane.f32.xlu0 %v1357_v10  ;;  %v1354_v12 = vsel %vm151_vm1, %v4498_v38, 0.0 }
 0x8d1   :  { %1355 = vadd.xlane.f32.xlu1 %v1354_v12 }
 0x95d   :  { %v1359_v6 = vpop.xlane.xlu0 %1358 }
 0x95e   :  { %v1361_v28 = vmul.f32 0.03125, %v1359_v6  ;;  %v1356_v3 = vpop.xlane.xlu1 %1355 }
 0x95f   :  { %v1360_v52 = vmul.f32 0.03125, %v1356_v3 }
 0x960   :  { %v1363_v37 = vsub.f32 %v4495_v60, %v1361_v28  ;;  %v1387_v28 = vadd.f32 1.0, %v4538_v5 }
 0x961   :  { %v1362_v30 = vsub.f32 %v4498_v38, %v1360_v52  ;;  %v1386_v52 = vadd.f32 1.0, %v4544_v17 }
 0x962   :  { %v1365_v16 = vmul.f32 %v1363_v37, %v1363_v37 }
 0x963   :  { %v1364_v42 = vmul.f32 %v1362_v30, %v1362_v30 }
 0x964   :  { %v1369_v29 = vsel %vm151_vm1, %v1365_v16, 0.0 }
 0x965   :  { %1370 = vadd.xlane.f32.xlu1 %v1369_v29  ;;  %v1366_v39 = vsel %vm151_vm1, %v1364_v42, 0.0 }
 0x966   :  { %1367 = vadd.xlane.f32.xlu0 %v1366_v39 }
 0x976   :  { %1394 = vrot.lane.b32.xlu1 %v4231_v51, %s4076_s12  ;;  %v1403_v51 = vld [vmem:[%s5023_s6 + $0x18] sm:$0xff] }
 0x97c   :  { %1392 = vrot.lane.b32.xlu0 %v4229_v50, %s4076_s12  ;;  %v3762_v50 = vpack.c.bf16 %v1403_v51, %v1402_v40  ;;  %v3241_v51 = vld [vmem:[%s5019_s3 + $0x60] sm:$0xff] }
 0x97e   :  { %3763 = vmatprep.subr.bf16.mxu0 %v3762_v50 }
 0x97f   :  { %3765 = vmatpush3.bf16.msra.mxu0 %v3762_v50  ;;  %v3243_v50 = vld [vmem:[%s5019_s3 + $0x70] sm:$0xff] }
 0x980   :  { %3799 = vmatprep.subr.bf16.mxu0 %v3798_v55  ;;  %v3804_v27 = vpack.c.bf16 %v3243_v50, %v3241_v51  ;;  %v1508_v55 = vld [vmem:[%s5024_s7 + $0x8] sm:$0xff] }
 0x9f2   :  { %v1371_v26 = vpop.xlane.xlu1 %1370 }
 0x9f3   :  { %v1373_v43 = vmul.f32 0.03125, %v1371_v26  ;;  %v1368_v54 = vpop.xlane.xlu0 %1367  ;;  %v3766_v26 = vpack.c.bf16 %v1508_v55, %v1507_v33 }
 0x9f4   :  { %v1372_v53 = vmul.f32 0.03125, %v1368_v54  ;;  %v1510_v54 = vld [vmem:[%s5024_s7 + $0x18] sm:$0xff] }
 0x9f5   :  { %v1375_v57 = vadd.f32 1e-05, %v1373_v43  ;;  %3767 = vmatprep.subr.bf16.mxu1 %v3766_v26  ;;  %v1509_v43 = vld [vmem:[%s5024_s7 + $0x10] sm:$0xff] }
 0x9f6   :  { %v1374_v62 = vadd.f32 1e-05, %v1372_v53  ;;  %v1395_v39 = vpop.permute.xlu1 %1394  ;;  %3769 = vmatpush3.bf16.msra.mxu1 %v3766_v26  ;;  %v3770_v53 = vpack.c.bf16 %v1510_v54, %v1509_v43 }
 0x9f7   :  { %4013 = vrsqrt.f32 %v1375_v57  ;;  %v1393_v29 = vpop.permute.xlu0 %1392  ;;  %v1511_v57 = vld [vmem:[%s5024_s7 + $0x20] sm:$0xff] }
 0x9f8   :  { %4015 = vrsqrt.f32 %v1374_v62  ;;  %3771 = vmatprep.subr.bf16.mxu1 %v3770_v53  ;;  %v1512_v62 = vld [vmem:[%s5024_s7 + $0x28] sm:$0xff] }
 0x9f9   :  { %v3774_v49 = vpack.c.bf16 %v1512_v62, %v1511_v57 }
 0x9fa   :  { %3773 = vmatpush3.bf16.msra.mxu1 %v3770_v53 }
 0x9fb   :  { %3775 = vmatprep.subr.bf16.mxu1 %v3774_v49 }
 0x9fe   :  { %3777 = vmatpush3.bf16.msra.mxu1 %v3774_v49 }
 0xa01   :  { %v4014_v1 = vpop.eup %4013 }
 0xa02   :  { %v4016_v10 = vpop.eup %4015  ;;  %v1379_v12 = vmul.f32 %v4014_v1, %v1363_v37  ;;  %v3242_v37 = vld [vmem:[%s5019_s3 + $0x68] sm:$0xff]  ;;  %v1514_v1 = vld [vmem:[%s5024_s7 + $0x38] sm:$0xff] }
 0xa03   :  { %v1378_v6 = vmul.f32 %v4016_v10, %v1362_v30  ;;  %v3244_v30 = vld [vmem:[%s5019_s3 + $0x78] sm:$0xff] }
 0xa04   :  { %v1385_v3 = vmul.f32 %v1383_v44, %v1379_v12  ;;  %v3802_v40 = vpack.c.bf16 %v3244_v30, %v3242_v37  ;;  %v1515_v12 = vld [vmem:[%s5024_s7 + $0x40] sm:$0xff]  ;;  %v1522_v37 = vld [vmem:[%s5024_s7 + $0x78] sm:$0xff] }
 0xa05   :  { %v1384_v16 = vmul.f32 %v1383_v44, %v1378_v6  ;;  %v1513_v44 = vld [vmem:[%s5024_s7 + $0x30] sm:$0xff]  ;;  %v1516_v6 = vld [vmem:[%s5024_s7 + $0x48] sm:$0xff] }
 0xa06   :  { %v1389_v42 = vmul.f32 %v1387_v28, %v1385_v3  ;;  %v3778_v10 = vpack.c.bf16 %v1514_v1, %v1513_v44  ;;  %v1517_v28 = vld [vmem:[%s5024_s7 + $0x50] sm:$0xff]  ;;  %v3782_v3 = vpack.c.bf16 %v1516_v6, %v1515_v12 }
 0xa07   :  { %v1388_v34 = vmul.f32 %v1386_v52, %v1384_v16  ;;  %v1518_v52 = vld [vmem:[%s5024_s7 + $0x58] sm:$0xff] }
 0xa08   :  { %v1399_v8 = vadd.f32 %v1395_v39, %v1389_v42  ;;  %3779 = vmatprep.subr.bf16.mxu1 %v3778_v10  ;;  %v3786_v16 = vpack.c.bf16 %v1518_v52, %v1517_v28  ;;  %v1519_v42 = vld [vmem:[%s5024_s7 + $0x60] sm:$0xff] }
 0xa09   :  { %v1398_v25 = vadd.f32 %v1393_v29, %v1388_v34  ;;  %3781 = vmatpush3.bf16.msra.mxu1 %v3778_v10  ;;  %v3790_v24 = vpack.c.bf16 %v1520_v36, %v1519_v42  ;;  %v1521_v34 = vld [vmem:[%s5024_s7 + $0x70] sm:$0xff]  ;;  %v1406_v29 = vsub.s32 2, %v4192_v23  ;;  %v1526_v36 = vrot.slane %v4225_v48, %v415_v63 }
 0xa0a   :  { %3783 = vmatprep.subr.bf16.mxu1 %v3782_v3  ;;  %v3794_v30 = vpack.c.bf16 %v1522_v37, %v1521_v34 }
 0xa0b   :  { %3528 = vmatprep.mubr.msk.f32.mxu0 %vm151_vm1, %v1398_v25  ;;  %v1407_v39 = vrot.slane %v4225_v48, %v1406_v29 }
 0xa0c   :  { %3529 = vmatmul.mubr.msk.f32.vlgmr.msra.gmra.mrb[16].mxu0 %vm151_vm1, %v1399_v8 }
 0xa0d   :  { %3801 = vmatpush1.bf16.msra.mxu0 %v3800_v56  ;;  %1707 = vmatprep.mubr.f32.mxu0 %v4074_v19 }
 0xa0e   :  { %3803 = vmatprep.subr.bf16.mxu0 %v3802_v40  ;;  %3785 = vmatpush3.bf16.msra.mxu1 %v3782_v3 }
 0xa0f   :  { %3787 = vmatprep.subr.bf16.mxu1 %v3786_v16 }
 0xa11   :  { %3805 = vmatpush1.bf16.msra.mxu0 %v3804_v27 }
 0xa12   :  { %3789 = vmatpush3.bf16.msra.mxu1 %v3786_v16 }
 0xa13   :  { %3791 = vmatprep.subr.bf16.mxu1 %v3790_v24 }
 0xa14   :  { %3245 = vmatmul.mubr.msk.f32.vlgmr.msra.gmra.mrb[18].mxu0 %vm151_vm1, %v4295_v46 }
 0xa15   :  { %1713 = vmatprep.mubr.f32.mxu0 %v4074_v19 }
 0xa16   :  { %3793 = vmatpush3.bf16.msra.mxu1 %v3790_v24 }
 0xa17   :  { %3795 = vmatprep.subr.bf16.mxu1 %v3794_v30 }
 0xa18   :  { %3246 = vmatmul.mubr.msk.f32.gmra.mrb[20].mxu0 %vm151_vm1, %v4293_v45 }
 0xa19   :  { %1845 = vmatprep.mubr.f32.mxu0 %v4074_v19 }
 0xa1a   :  { %3797 = vmatpush3.bf16.msra.mxu1 %v3794_v30 }
 0xadf   :  { %v3530_v25 = vpop.f32.mrb[16].mxu0 }
 0xae0   :  { %v1486_v56 = vadd.f32 %v3530_v25, %v1407_v39  ;;  %v1480_v8 = vpop.f32.mrb[17].mxu0 }
 0xae1   :  { %v1481_v40 = vadd.f32 %v1480_v8, %v1407_v39 }
 0xae2   :  { %v1490_v51 = vmul.f32 %v1486_v56, %v1486_v56 }
 0xae3   :  { %v1489_v50 = vmul.f32 %v1481_v40, %v1481_v40 }
 0xae4   :  { %v1492_v27 = vmul.f32 %v1490_v51, %v1486_v56 }
 0xae5   :  { %v1491_v33 = vmul.f32 %v1489_v50, %v1481_v40 }
 0xae6   :  { %v1494_v55 = vmul.f32 0.044715, %v1492_v27 }
 0xae7   :  { %v1493_v26 = vmul.f32 0.044715, %v1491_v33  ;;  %v1709_v43 = vpop.f32.mrb[18].mxu0 }
 0xae8   :  { %v1496_v54 = vadd.f32 %v1494_v55, %v1486_v56  ;;  %v4627_v53 = vpop.f32.mrb[19].mxu0 }
 0xae9   :  { %v1495_v57 = vadd.f32 %v1493_v26, %v1481_v40 }
 0xaea   :  { %v1498_v62 = vmul.f32 0.7978846, %v1496_v54 }
 0xaeb   :  { %v1497_v49 = vmul.f32 0.7978846, %v1495_v57  ;;  %v1715_v44 = vpop.f32.mrb[20].mxu0 }
 0xaec   :  { %4017 = vtanh.f32 %v1498_v62  ;;  %v4629_v1 = vpop.f32.mrb[21].mxu0 }
 0xaed   :  { %4019 = vtanh.f32 %v1497_v49  ;;  %v4657_v49 = vld [vmem:[%s5020_s1 + $0x10] sm:$0xff] }
 0xaf6   :  { %v4018_v10 = vpop.eup %4017 }
 0xaf7   :  { %v4020_v12 = vpop.eup %4019  ;;  %v1502_v6 = vadd.f32 1.0, %v4018_v10  ;;  %v1634_v10 = vrot.slane %v4657_v49, %v4355_v18 }
 0xaf8   :  { %v1501_v28 = vadd.f32 1.0, %v4020_v12 }
 0xaf9   :  { %v1504_v3 = vmul.f32 0.5, %v1502_v6  ;;  %v4661_v12 = vadd.f32 %v1715_v44, %v1634_v10 }
 0xafa   :  { %v1503_v52 = vmul.f32 0.5, %v1501_v28  ;;  %v4664_v28 = vadd.f32 %v1709_v43, %v1634_v10  ;;  %v3247_v43 = vld [vmem:[%s5021_s4 + $0x40] sm:$0xff] }
 0xafb   :  { %v1506_v42 = vmul.f32 %v1504_v3, %v1486_v56  ;;  %v1753_v6 = vadd.f32 1.0, %v4661_v12 }
 0xafc   :  { %v1505_v16 = vmul.f32 %v1503_v52, %v1481_v40  ;;  %v1752_v3 = vadd.f32 1.0, %v4664_v28  ;;  %v3248_v52 = vld [vmem:[%s5021_s4 + $0x48] sm:$0xff] }
 0xafe   :  { %3563 = vmatprep.mubr.f32.mxu1 %v1505_v16  ;;  %v3250_v16 = vld [vmem:[%s5021_s4 + $0x58] sm:$0xff] }
 0xaff   :  { %3564 = vmatmul.mubr.f32.vlgmr.msra.gmra.mrb[6].mxu1 %v1506_v42  ;;  %v3806_v44 = vpack.c.bf16 %v3250_v16, %v3248_v52  ;;  %v3249_v42 = vld [vmem:[%s5021_s4 + $0x50] sm:$0xff] }
 0xb01   :  { %3807 = vmatprep.subr.bf16.mxu0 %v3806_v44 }
 0xbd2   :  { %v3565_v24 = vpop.f32.mrb[6].mxu1 }
 0xbd3   :  { %v1599_v34 = vadd.f32 %v3565_v24, %v1526_v36  ;;  %v1593_v37 = vpop.f32.mrb[7].mxu1  ;;  %v3252_v24 = vld [vmem:[%s5021_s4 + $0x68] sm:$0xff] }
 0xbd4   :  { %v1594_v30 = vadd.f32 %v1593_v37, %v1526_v36  ;;  %v3808_v36 = vpack.c.bf16 %v3249_v42, %v3247_v43 }
 0xbd5   :  { %1606 = vrot.lane.b32.xlu0 %v1599_v34, %s4076_s12  ;;  %v3254_v34 = vld [vmem:[%s5021_s4 + $0x78] sm:$0xff] }
 0xbd6   :  { %1604 = vrot.lane.b32.xlu1 %v1594_v30, %s4076_s12  ;;  %3809 = vmatpush1.bf16.msra.mxu0 %v3808_v36  ;;  %v3810_v37 = vpack.c.bf16 %v3254_v34, %v3252_v24  ;;  %v3251_v30 = vld [vmem:[%s5021_s4 + $0x60] sm:$0xff] }
 0xbd8   :  { %3811 = vmatprep.subr.bf16.mxu0 %v3810_v37 }
 0xc47   :  { %v1607_v39 = vpop.permute.xlu0 %1606 }
 0xc48   :  { %v1611_v25 = vmul.f32 %v1607_v39, %v4538_v5  ;;  %v1605_v8 = vpop.permute.xlu1 %1604  ;;  %v3253_v39 = vld [vmem:[%s5021_s4 + $0x70] sm:$0xff] }
 0xc49   :  { %v1610_v56 = vmul.f32 %v1605_v8, %v4544_v17 }
 0xc4a   :  { %1616 = vrot.lane.b32.xlu0 %v1611_v25, %s4075_s17  ;;  %v3812_v25 = vpack.c.bf16 %v3253_v39, %v3251_v30 }
 0xc4b   :  { %1614 = vrot.lane.b32.xlu1 %v1610_v56, %s4075_s17 }
 0xc4c   :  { %3813 = vmatpush1.bf16.msra.mxu0 %v3812_v25 }
 0xcbc   :  { %v1617_v40 = vpop.permute.xlu0 %1616 }
 0xcbd   :  { %v4641_v48 = vadd.f32 %v1617_v40, %v4495_v60  ;;  %v1615_v63 = vpop.permute.xlu1 %1614 }
 0xcbe   :  { %v4644_v51 = vadd.f32 %v1615_v63, %v4498_v38 }
 0xcbf   :  { %v1723_v50 = vsel %vm151_vm1, %v4641_v48, 0.0 }
 0xcc0   :  { %1724 = vadd.xlane.f32.xlu0 %v1723_v50  ;;  %v1720_v5 = vsel %vm151_vm1, %v4644_v51, 0.0 }
 0xcc1   :  { %1721 = vadd.xlane.f32.xlu1 %v1720_v5 }
 0xd4d   :  { %v1725_v17 = vpop.xlane.xlu0 %1724 }
 0xd4e   :  { %v1727_v27 = vmul.f32 0.03125, %v1725_v17  ;;  %v1722_v33 = vpop.xlane.xlu1 %1721 }
 0xd4f   :  { %v1726_v55 = vmul.f32 0.03125, %v1722_v33 }
 0xd50   :  { %v1729_v26 = vsub.f32 %v4641_v48, %v1727_v27  ;;  %v1749_v27 = vrot.slane %v4657_v49, %v546_v59 }
 0xd51   :  { %v1728_v60 = vsub.f32 %v4644_v51, %v1726_v55 }
 0xd52   :  { %v1731_v54 = vmul.f32 %v1729_v26, %v1729_v26 }
 0xd53   :  { %v1730_v57 = vmul.f32 %v1728_v60, %v1728_v60 }
 0xd54   :  { %v1735_v38 = vsel %vm151_vm1, %v1731_v54, 0.0 }
 0xd55   :  { %1736 = vadd.xlane.f32.xlu1 %v1735_v38  ;;  %v1732_v62 = vsel %vm151_vm1, %v1730_v57, 0.0 }
 0xd56   :  { %1733 = vadd.xlane.f32.xlu0 %v1732_v62 }
 0xd66   :  { %1758 = vrot.lane.b32.xlu1 %v1753_v6, %s4075_s17 }
 0xd6c   :  { %1756 = vrot.lane.b32.xlu0 %v1752_v3, %s4075_s17 }
 0xde2   :  { %v1737_v8 = vpop.xlane.xlu1 %1736 }
 0xde3   :  { %v1739_v56 = vmul.f32 0.03125, %v1737_v8  ;;  %v1734_v40 = vpop.xlane.xlu0 %1733 }
 0xde4   :  { %v1738_v63 = vmul.f32 0.03125, %v1734_v40 }
 0xde5   :  { %v1741_v50 = vadd.f32 1e-05, %v1739_v56 }
 0xde6   :  { %v1740_v5 = vadd.f32 1e-05, %v1738_v63  ;;  %v1759_v6 = vpop.permute.xlu1 %1758 }
 0xde7   :  { %4021 = vrsqrt.f32 %v1741_v50  ;;  %v1757_v62 = vpop.permute.xlu0 %1756 }
 0xde8   :  { %4023 = vrsqrt.f32 %v1740_v5 }
 0xdf1   :  { %v4022_v17 = vpop.eup %4021 }
 0xdf2   :  { %v4024_v33 = vpop.eup %4023  ;;  %v1745_v55 = vmul.f32 %v4022_v17, %v1729_v26  ;;  %v4070_v17 = vld [vmem:[%s5018_s0] sm:$0xff] }
 0xdf3   :  { %v1744_v54 = vmul.f32 %v4024_v33, %v1728_v60 }
 0xdf4   :  { %v1751_v57 = vmul.f32 %v1749_v27, %v1745_v55 }
 0xdf5   :  { %v1750_v38 = vmul.f32 %v1749_v27, %v1744_v54 }
 0xdf6   :  { %v1763_v3 = vmul.f32 %v1759_v6, %v1751_v57 }
 0xdf7   :  { %v1762_v10 = vmul.f32 %v1757_v62, %v1750_v38 }
 0xdf8   :  { %v1765_v16 = vadd.f32 %v1763_v3, %v4661_v12 }
 0xdf9   :  { %v1764_v52 = vadd.f32 %v1762_v10, %v4664_v28  ;;  %v4071_v10 = vld [vmem:[%s5018_s0 + $0x10] sm:$0xff] }
 0xdfb   :  { %3255 = vmatmul.mubr.msk.f32.vlgmr.msra.gmra.mrb[22].mxu0 %vm151_vm1, %v1764_v52 }
 0xdfc   :  { %1851 = vmatprep.mubr.f32.mxu0 %v4074_v19 }
 0xdff   :  { %3256 = vmatmul.mubr.msk.f32.gmra.mrb[24].mxu0 %vm151_vm1, %v1765_v16 }
 0xece   :  { %v1847_v59 = vpop.f32.mrb[22].mxu0 }
 0xecf   :  { %v1849_v44 = vpop.f32.mrb[23].mxu0  ;;  %v4704_v43 = vmul.f32 %v1847_v59, %v4419_v61  ;;  %v4710_v19 = vmul.f32 %v1847_v59, %v4427_v7  ;;  %v4713_v24 = vmul.f32 %v1847_v59, %v4433_v15  ;;  %v4716_v34 = vmul.f32 %v1847_v59, %v4413_v58 }
 0xed0   :  { %v1874_v26 = vmul.f32 %v1849_v44, %v4278_v35  ;;  %v1872_v8 = vmul.f32 %v1847_v59, %v4295_v46  ;;  %v1858_v27 = vmul.f32 %v4070_v17, %v1847_v59 }
 0xed2   :  { %1878 = vrot.lane.b32.xlu1 %v1874_v26, %s4076_s12  ;;  %v1853_v60 = vpop.f32.mrb[24].mxu0 }
 0xed3   :  { %v1855_v42 = vpop.f32.mrb[25].mxu0  ;;  %v4707_v36 = vmul.f32 %v1853_v60, %v4419_v61  ;;  %v4720_v37 = vmul.f32 %v1853_v60, %v4427_v7  ;;  %v4723_v30 = vmul.f32 %v1853_v60, %v4433_v15  ;;  %v4726_v61 = vmul.f32 %v1853_v60, %v4413_v58 }
 0xed4   :  { %v1875_v35 = vmul.f32 %v1855_v42, %v4286_v41  ;;  %v1860_v15 = vmul.f32 %v1847_v59, %v4182_v20  ;;  %v1873_v56 = vmul.f32 %v1853_v60, %v4293_v45  ;;  %v1861_v54 = vmul.f32 %v1853_v60, %v4187_v21 }
 0xed5   :  { %v3957_v39 = vpack.i.bf16 %v4707_v36, %v4704_v43  ;;  %v3967_v25 = vpack.i.bf16 %v4720_v37, %v4710_v19  ;;  %v3972_v41 = vpack.i.bf16 %v4723_v30, %v4713_v24  ;;  %v3962_v7 = vpack.i.bf16 %v4726_v61, %v4716_v34 }
 0xed6   :  { %1880 = vrot.lane.b32.xlu0 %v1875_v35, %s4076_s12  ;;  %v1859_v6 = vmul.f32 %v4071_v10, %v1853_v60 }
 0xeda   :  { %1864 = vrot.lane.b32.xlu0 %v1860_v15, %s4076_s12 }
 0xf44   :  { %v1879_v58 = vpop.permute.xlu1 %1878 }
 0xf45   :  { %v1884_v63 = vadd.f32 %v1879_v58, %v1872_v8 }
 0xf48   :  { %v1881_v40 = vpop.permute.xlu0 %1880 }
 0xf49   :  { %v1885_v50 = vadd.f32 %v1881_v40, %v1873_v56 }
 0xf4b   :  { %v3952_v5 = vpack.i.bf16 %v1885_v50, %v1884_v63 }
 0xf4c   :  { %v1865_v33 = vpop.permute.xlu0 %1864 }
 0xf4d   :  { %v1870_v55 = vadd.f32 %v1865_v33, %v1858_v27  ;;  %3953 = vrot.lane.b32.xlu1 %v3952_v5, %s4075_s17 }
 0xf4f   :  { %v1886_v20 = vmul.f32 %v1870_v55, %v4331_v4  ;;  %v2003_v52 = vmul.f32 %v1870_v55, %v4320_v2  ;;  %v2288_v59 = vmul.f32 %v1870_v55, %v4347_v14  ;;  %v2486_v44 = vmul.f32 %v1870_v55, %v4364_v22 }
 0xf51   :  { %3570 = vmatprep.mubr.msk.f32.mxu0 %vm151_vm1, %v1886_v20  ;;  %1866 = vrot.lane.b32.xlu1 %v1861_v54, %s4076_s12 }
 0xfbf   :  { %v3954_v45 = vpop.permute.xlu1 %3953 }
 0xfc0   :  { %v3956_v46 = vunpack.i.h.bf16 %v3954_v45  ;;  %v3955_v57 = vunpack.i.l.bf16 %v3954_v45 }
 0xfc2   :  { %v3814_v38 = vpack.c.bf16 %v3956_v46, %v3955_v57 }
 0xfc3   :  { %v1867_v62 = vpop.permute.xlu1 %1866 }
 0xfc4   :  { %3816 = vmatprep.subr.msk.bf16.mxu0 %vm4311_vm2, %v3814_v38  ;;  %v1871_v21 = vadd.f32 %v1867_v62, %v1859_v6 }
 0xfc5   :  { %3819 = vmatpush3.bf16.xpose.msk.msra.mxu0 %vm4311_vm2, %v3814_v38 }
 0xfc6   :  { %3822 = vmatprep.subr.msk.bf16.mxu0 %vm4311_vm2, %v3814_v38  ;;  %v1887_v3 = vmul.f32 %v1871_v21, %v4331_v4  ;;  %v2004_v16 = vmul.f32 %v1871_v21, %v4320_v2  ;;  %v2289_v4 = vmul.f32 %v1871_v21, %v4347_v14  ;;  %v2487_v2 = vmul.f32 %v1871_v21, %v4364_v22 }
 0xfcc   :  { %3571 = vmatmul.mubr.msk.f32.vlgmr.msra.gmra.mrb[26].mxu0 %vm151_vm1, %v1887_v3 }
 0xfcd   :  { %3825 = vmatpush3.bf16.xpose.msk.msra.mxu0 %vm4311_vm2, %v3814_v38  ;;  %3577 = vmatprep.mubr.msk.f32.mxu0 %vm151_vm1, %v2003_v52 }
 0xfce   :  { %3836 = vmatprep.subr.msk.bf16.mxu0 %vm4311_vm2, %v3814_v38 }
 0xfd4   :  { %3578 = vmatmul.mubr.msk.f32.vlgmr.msra.gmra.mrb[28].mxu0 %vm151_vm1, %v2004_v16 }
 0xfd5   :  { %3839 = vmatpush3.bf16.xpose.msk.msra.mxu0 %vm4311_vm2, %v3814_v38  ;;  %3598 = vmatprep.mubr.msk.f32.mxu0 %vm151_vm1, %v2288_v59 }
 0xfd6   :  { %3846 = vmatprep.subr.msk.bf16.mxu0 %vm4311_vm2, %v3814_v38 }
 0xfdc   :  { %3599 = vmatmul.mubr.msk.f32.vlgmr.msra.gmra.mrb[30].mxu0 %vm151_vm1, %v2289_v4 }
 0xfdd   :  { %3849 = vmatpush3.bf16.xpose.msk.msra.mxu0 %vm4311_vm2, %v3814_v38  ;;  %3612 = vmatprep.mubr.msk.f32.mxu0 %vm151_vm1, %v2486_v44 }
 0xfe4   :  { %3613 = vmatmul.mubr.msk.f32.vlgmr.msra.gmra.mrb[32].mxu0 %vm151_vm1, %v2487_v2 }
0x109f   :  { %v3572_v26 = vpop.f32.mrb[26].mxu0 }
0x10a0   :  { %v1970_v60 = vpop.f32.mrb[27].mxu0  ;;  %v1976_v22 = vadd.f32 %v3572_v26, %v4374_v31 }
0x10a1   :  { %v1971_v8 = vadd.f32 %v1970_v60, %v4376_v32 }
0x10a2   :  { %v1982_v27 = vsel %vm47_vm0, %v1976_v22, -inf }
0x10a3   :  { %v1979_v40 = vsel %vm47_vm0, %v1971_v8, -inf }
0x10a7   :  { %v3579_v42 = vpop.f32.mrb[28].mxu0 }
0x10a8   :  { %v2083_v35 = vadd.f32 %v3579_v42, %v4374_v31  ;;  %v2077_v15 = vpop.f32.mrb[29].mxu0 }
0x10a9   :  { %v2078_v14 = vadd.f32 %v2077_v15, %v4376_v32 }
0x10aa   :  { %v2089_v58 = vsel %vm47_vm0, %v2083_v35, -inf }
0x10ab   :  { %2090 = vmax.xlane.f32.xlu1 %v2089_v58  ;;  %v2086_v0 = vsel %vm47_vm0, %v2078_v14, -inf }
0x10ac   :  { %2087 = vmax.xlane.f32.xlu0 %v2086_v0 }
0x10af   :  { %v3600_v56 = vpop.f32.mrb[30].mxu0 }
0x10b0   :  { %v2362_v63 = vpop.f32.mrb[31].mxu0  ;;  %1980 = vmax.xlane.f32.xlu0 %v1979_v40  ;;  %v2368_v5 = vadd.f32 %v3600_v56, %v4374_v31 }
0x10b1   :  { %v2363_v50 = vadd.f32 %v2362_v63, %v4376_v32 }
0x10b2   :  { %v2374_v55 = vsel %vm47_vm0, %v2368_v5, -inf }
0x10b3   :  { %v2371_v17 = vsel %vm47_vm0, %v2363_v50, -inf }
0x10b4   :  { %2372 = vmax.xlane.f32.xlu1 %v2371_v17  ;;  %1983 = vmax.xlane.f32.xlu0 %v1982_v27 }
0x10b7   :  { %v3614_v33 = vpop.f32.mrb[32].mxu0 }
0x10b8   :  { %v2566_v20 = vadd.f32 %v3614_v33, %v4374_v31  ;;  %v2560_v54 = vpop.f32.mrb[33].mxu0  ;;  %2375 = vmax.xlane.f32.xlu0 %v2374_v55 }
0x10b9   :  { %v2561_v45 = vadd.f32 %v2560_v54, %v4376_v32 }
0x10ba   :  { %v2572_v46 = vsel %vm47_vm0, %v2566_v20, -inf }
0x10bb   :  { %v2569_v57 = vsel %vm47_vm0, %v2561_v45, -inf }
0x10bc   :  { %2570 = vmax.xlane.f32.xlu1 %v2569_v57  ;;  %2573 = vmax.xlane.f32.xlu0 %v2572_v46 }
0x10cd   :  { %3958 = vrot.lane.b32.xlu1 %v3957_v39, %s4073_s15 }
0x1138   :  { %v2091_v10 = vpop.xlane.xlu1 %2090 }
0x1139   :  { %v2088_v38 = vpop.xlane.xlu0 %2087  ;;  %v2093_v52 = vsub.f32 %v2083_v35, %v2091_v10 }
0x113a   :  { %v2092_v62 = vsub.f32 %v2078_v14, %v2088_v38 }
0x113b   :  { %v2096_v26 = vmul.f32 1.442695, %v2093_v52 }
0x113c   :  { %v2094_v21 = vmul.f32 1.442695, %v2092_v62 }
0x113d   :  { %v1981_v6 = vpop.xlane.xlu0 %1980 }
0x113e   :  { %v1985_v31 = vsub.f32 %v1971_v8, %v1981_v6 }
0x1140   :  { %v1987_v3 = vmul.f32 1.442695, %v1985_v31 }
0x1141   :  { %v2373_v32 = vpop.xlane.xlu1 %2372  ;;  %v1984_v16 = vpop.xlane.xlu0 %1983 }
0x1142   :  { %4025 = vpow2.f32 %v1987_v3  ;;  %v2377_v59 = vsub.f32 %v2363_v50, %v2373_v32  ;;  %v1986_v4 = vsub.f32 %v1976_v22, %v1984_v16 }
0x1143   :  { %4027 = vpow2.f32 %v2094_v21 }
0x1144   :  { %v2379_v44 = vmul.f32 1.442695, %v2377_v59  ;;  %v1989_v2 = vmul.f32 1.442695, %v1986_v4 }
0x1145   :  { %v2376_v60 = vpop.xlane.xlu0 %2375 }
0x1146   :  { %v2378_v43 = vsub.f32 %v2368_v5, %v2376_v60  ;;  %4029 = vpow2.f32 %v1989_v2 }
0x1147   :  { %4031 = vpow2.f32 %v2379_v44 }
0x1148   :  { %4033 = vpow2.f32 %v2096_v26  ;;  %v2381_v36 = vmul.f32 1.442695, %v2378_v43 }
0x1149   :  { %v2571_v39 = vpop.xlane.xlu1 %2570  ;;  %v2574_v42 = vpop.xlane.xlu0 %2573 }
0x114a   :  { %v2576_v15 = vsub.f32 %v2566_v20, %v2574_v42  ;;  %4035 = vpow2.f32 %v2381_v36  ;;  %v2575_v35 = vsub.f32 %v2561_v45, %v2571_v39 }
0x114c   :  { %v4026_v14 = vpop.eup %4025  ;;  %v2579_v58 = vmul.f32 1.442695, %v2576_v15  ;;  %v2577_v5 = vmul.f32 1.442695, %v2575_v35 }
0x114d   :  { %v3959_v8 = vpop.permute.xlu1 %3958  ;;  %v1991_v0 = vsel %vm47_vm0, %v4026_v14, 0.0  ;;  %v4028_v22 = vpop.eup %4027 }
0x114e   :  { %v3961_v56 = vunpack.i.h.bf16 %v3959_v8  ;;  %v3960_v40 = vunpack.i.l.bf16 %v3959_v8  ;;  %1992 = vadd.xlane.f32.xlu1 %v1991_v0  ;;  %4037 = vpow2.f32 %v2579_v58  ;;  %v2098_v17 = vsel %vm47_vm0, %v4028_v22, 0.0  ;;  %v3281_v0 = vld [vmem:[%s5022_s5 + $0x20] sm:$0xff] }
0x114f   :  { %4039 = vpow2.f32 %v2577_v5 }
0x1150   :  { %v3826_v63 = vpack.c.bf16 %v3961_v56, %v3960_v40  ;;  %v4803_v50 = vpop.eup %4029 }
0x1151   :  { %v4806_v27 = vpop.eup %4031  ;;  %v1994_v33 = vsel %vm47_vm0, %v4803_v50, 0.0 }
0x1152   :  { %3827 = vmatprep.subr.bf16.mxu1 %v3826_v63  ;;  %2099 = vadd.xlane.f32.xlu1 %v2098_v17  ;;  %v4034_v55 = vpop.eup %4033  ;;  %v2383_v20 = vsel %vm47_vm0, %v4806_v27, 0.0  ;;  %v3283_v17 = vld [vmem:[%s5022_s5 + $0x30] sm:$0xff] }
0x1153   :  { %1995 = vadd.xlane.f32.xlu0 %v1994_v33  ;;  %3829 = vmatpush3.bf16.msra.mxu1 %v3826_v63  ;;  %v2101_v54 = vsel %vm47_vm0, %v4034_v55, 0.0 }
0x1154   :  { %v4813_v45 = vpop.eup %4035 }
0x1155   :  { %v2386_v46 = vsel %vm47_vm0, %v4813_v45, 0.0 }
0x1156   :  { %2384 = vadd.xlane.f32.xlu1 %v2383_v20 }
0x1157   :  { %2102 = vadd.xlane.f32.xlu0 %v2101_v54 }
0x1158   :  { %v4817_v57 = vpop.eup %4037 }
0x1159   :  { %v2584_v38 = vsel %vm47_vm0, %v4817_v57, 0.0  ;;  %v4040_v62 = vpop.eup %4039 }
0x115a   :  { %v2581_v10 = vsel %vm47_vm0, %v4040_v62, 0.0 }
0x115b   :  { %2387 = vadd.xlane.f32.xlu0 %v2386_v46 }
0x115f   :  { %2585 = vadd.xlane.f32.xlu0 %v2584_v38 }
0x1163   :  { %2582 = vadd.xlane.f32.xlu0 %v2581_v10 }
0x1167   :  { %3968 = vrot.lane.b32.xlu1 %v3967_v25, %s4073_s15 }
0x116b   :  { %3973 = vrot.lane.b32.xlu1 %v3972_v41, %s4073_s15 }
0x1179   :  { %3963 = vrot.lane.b32.xlu0 %v3962_v7, %s4073_s15 }
0x11db   :  { %v1993_v6 = vpop.xlane.xlu1 %1992 }
0x11df   :  { %v2100_v31 = vpop.xlane.xlu1 %2099 }
0x11e0   :  { %4041 = vrcp.f32 %v2100_v31  ;;  %v1996_v21 = vpop.xlane.xlu0 %1995 }
0x11e1   :  { %4043 = vrcp.f32 %v1993_v6 }
0x11e3   :  { %v2385_v37 = vpop.xlane.xlu1 %2384 }
0x11e4   :  { %v2103_v3 = vpop.xlane.xlu0 %2102 }
0x11e5   :  { %4045 = vrcp.f32 %v2103_v3 }
0x11e6   :  { %4047 = vrcp.f32 %v1996_v21 }
0x11e7   :  { %4049 = vrcp.f32 %v2385_v37  ;;  %v3969_v61 = vpop.permute.xlu1 %3968 }
0x11e8   :  { %v2388_v52 = vpop.xlane.xlu0 %2387  ;;  %v3971_v59 = vunpack.i.h.bf16 %v3969_v61  ;;  %v3970_v4 = vunpack.i.l.bf16 %v3969_v61 }
0x11e9   :  { %4051 = vrcp.f32 %v2388_v52 }
0x11ea   :  { %v4042_v19 = vpop.eup %4041  ;;  %v3840_v39 = vpack.c.bf16 %v3971_v59, %v3970_v4  ;;  %v3289_v59 = vld [vmem:[%s5023_s6 + $0x30] sm:$0xff]  ;;  %v3290_v4 = vld [vmem:[%s5023_s6 + $0x38] sm:$0xff] }
0x11eb   :  { %v2105_v25 = vmul.f32 %v4042_v19, %v4028_v22  ;;  %v4044_v24 = vpop.eup %4043  ;;  %v3974_v26 = vpop.permute.xlu1 %3973  ;;  %v3282_v22 = vld [vmem:[%s5022_s5 + $0x28] sm:$0xff] }
0x11ec   :  { %v2586_v32 = vpop.xlane.xlu0 %2585  ;;  %v1998_v7 = vmul.f32 %v4044_v24, %v4026_v14  ;;  %v3976_v42 = vunpack.i.h.bf16 %v3974_v26  ;;  %v3975_v15 = vunpack.i.l.bf16 %v3974_v26  ;;  %v3854_v63 = vpack.c.bf16 %v3282_v22, %v3281_v0 }
0x11ed   :  { %3584 = vmatprep.mubr.msk.f32.mxu1 %vm47_vm0, %v2105_v25 }
0x11ee   :  { %v3850_v58 = vpack.c.bf16 %v3976_v42, %v3975_v15  ;;  %v2819_v15 = vrot.slane %v4657_v49, %v839_v9 }
0x11ef   :  { %v4046_v30 = vpop.eup %4045 }
0x11f0   :  { %v2107_v34 = vmul.f32 %v4046_v30, %v4034_v55  ;;  %v2583_v41 = vpop.xlane.xlu0 %2582  ;;  %v4048_v43 = vpop.eup %4047 }
0x11f1   :  { %4053 = vrcp.f32 %v2583_v41  ;;  %v4050_v36 = vpop.eup %4049  ;;  %v2000_v14 = vmul.f32 %v4048_v43, %v4803_v50 }
0x11f2   :  { %3585 = vmatmul.mubr.msk.f32.vlgmr.msra.gmra.mrb[8].mxu1 %vm47_vm0, %v2107_v34  ;;  %v2390_v35 = vmul.f32 %v4050_v36, %v4806_v27  ;;  %4055 = vrcp.f32 %v2586_v32  ;;  %v3284_v27 = vld [vmem:[%s5022_s5 + $0x38] sm:$0xff] }
0x11f3   :  { %3591 = vmatprep.mubr.msk.f32.mxu1 %vm47_vm0, %v1998_v7  ;;  %v4052_v8 = vpop.eup %4051  ;;  %v3858_v55 = vpack.c.bf16 %v3284_v27, %v3283_v17  ;;  %v3288_v7 = vld [vmem:[%s5023_s6 + $0x28] sm:$0xff] }
0x11f4   :  { %v3964_v16 = vpop.permute.xlu0 %3963  ;;  %v2392_v40 = vmul.f32 %v4052_v8, %v4813_v45  ;;  %v3294_v17 = vld [vmem:[%s5024_s7 + $0x88] sm:$0xff] }
0x11f5   :  { %v3966_v44 = vunpack.i.h.bf16 %v3964_v16  ;;  %v3965_v2 = vunpack.i.l.bf16 %v3964_v16 }
0x11f7   :  { %v3830_v60 = vpack.c.bf16 %v3966_v44, %v3965_v2 }
0x11f9   :  { %3831 = vmatprep.subr.bf16.mxu1 %v3830_v60 }
0x11fa   :  { %3833 = vmatpush3.bf16.msra.mxu1 %v3830_v60 }
0x11fb   :  { %3841 = vmatprep.subr.bf16.mxu1 %v3840_v39  ;;  %v4054_v56 = vpop.eup %4053 }
0x11fc   :  { %v2588_v50 = vmul.f32 %v4054_v56, %v4040_v62  ;;  %v4056_v5 = vpop.eup %4055 }
0x11fd   :  { %3592 = vmatmul.mubr.msk.f32.vlgmr.msra.gmra.mrb[8].mxu1 %vm47_vm0, %v2000_v14  ;;  %v2590_v33 = vmul.f32 %v4056_v5, %v4817_v57 }
0x11fe   :  { %3843 = vmatpush3.bf16.msra.mxu1 %v3840_v39  ;;  %3605 = vmatprep.mubr.msk.f32.mxu1 %vm47_vm0, %v2390_v35  ;;  %v1638_v39 = vrot.slane %v4533_v13, %v4355_v18 }
0x11ff   :  { %3851 = vmatprep.subr.bf16.mxu1 %v3850_v58 }
0x1200   :  { %v4899_v42 = vadd.f32 %v4627_v53, %v1638_v39  ;;  %v4908_v8 = vadd.f32 %v4629_v1, %v1638_v39  ;;  %v3293_v1 = vld [vmem:[%s5024_s7 + $0x80] sm:$0xff] }
0x1201   :  { %v3870_v27 = vpack.c.bf16 %v3294_v17, %v3293_v1 }
0x1205   :  { %3606 = vmatmul.mubr.msk.f32.vlgmr.msra.gmra.mrb[8].mxu1 %vm47_vm0, %v2392_v40  ;;  %v4912_v40 = vadd.f32 1.0, %v4908_v8 }
0x1206   :  { %3853 = vmatpush3.bf16.msra.mxu1 %v3850_v58  ;;  %3619 = vmatprep.mubr.msk.f32.mxu1 %vm47_vm0, %v2588_v50  ;;  %v4905_v58 = vadd.f32 1.0, %v4899_v42 }
0x1207   :  { %3855 = vmatprep.subr.bf16.mxu1 %v3854_v63 }
0x120d   :  { %3620 = vmatmul.mubr.msk.f32.vlgmr.msra.gmra.mrb[8].mxu1 %vm47_vm0, %v2590_v33  ;;  %v3295_v33 = vld [vmem:[%s5024_s7 + $0x90] sm:$0xff] }
0x120e   :  { %3857 = vmatpush3.bf16.msra.mxu1 %v3854_v63 }
0x120f   :  { %3859 = vmatprep.subr.bf16.mxu1 %v3858_v55 }
0x1212   :  { %3861 = vmatpush3.bf16.msra.mxu1 %v3858_v55  ;;  %v3296_v55 = vld [vmem:[%s5024_s7 + $0x98] sm:$0xff] }
0x1213   :  { %3871 = vmatprep.subr.bf16.mxu1 %v3870_v27 }
0x12e0   :  { %v3621_v20 = vpop.f32.mrb[8].mxu1 }
0x12e1   :  { %v2673_v54 = vpop.f32.mrb[9].mxu1 }
0x12e2   :  { %3630 = vmatprep.mubr.msk.f32.mxu1 %vm151_vm1, %v2673_v54  ;;  %v3297_v54 = vld [vmem:[%s5024_s7 + $0xa0] sm:$0xff] }
0x12e3   :  { %3631 = vmatmul.mubr.msk.f32.vlgmr.msra.gmra.mrb[10].mxu1 %vm151_vm1, %v3621_v20  ;;  %v3874_v20 = vpack.c.bf16 %v3296_v55, %v3295_v33 }
0x12e4   :  { %3873 = vmatpush3.bf16.msra.mxu1 %v3870_v27 }
0x12e5   :  { %3875 = vmatprep.subr.bf16.mxu1 %v3874_v20 }
0x12e8   :  { %3877 = vmatpush3.bf16.msra.mxu1 %v3874_v20 }
0x13b6   :  { %v3632_v45 = vpop.f32.mrb[10].mxu1 }
0x13b7   :  { %v2761_v46 = vpop.f32.mrb[11].mxu1 }
0x13b8   :  { %2772 = vrot.lane.b32.xlu1 %v2761_v46, %s4073_s15 }
0x13bc   :  { %2774 = vrot.lane.b32.xlu1 %v3632_v45, %s4073_s15  ;;  %v3298_v45 = vld [vmem:[%s5024_s7 + $0xa8] sm:$0xff] }
0x13bd   :  { %v3878_v46 = vpack.c.bf16 %v3298_v45, %v3297_v54 }
0x13bf   :  { %3879 = vmatprep.subr.bf16.mxu1 %v3878_v46 }
0x13c0   :  { %3881 = vmatpush3.bf16.msra.mxu1 %v3878_v46 }
0x142a   :  { %v2773_v38 = vpop.permute.xlu1 %2772 }
0x142b   :  { %v2778_v57 = vmul.f32 %v2773_v38, %v4664_v28  ;;  %v3299_v38 = vld [vmem:[%s5024_s7 + $0xb0] sm:$0xff] }
0x142d   :  { %2782 = vrot.lane.b32.xlu0 %v2778_v57, %s4073_s15  ;;  %v3300_v57 = vld [vmem:[%s5024_s7 + $0xb8] sm:$0xff] }
0x142e   :  { %v2775_v62 = vpop.permute.xlu1 %2774 }
0x142f   :  { %v2779_v10 = vmul.f32 %v2775_v62, %v4661_v12  ;;  %v3882_v62 = vpack.c.bf16 %v3300_v57, %v3299_v38 }
0x1431   :  { %2784 = vrot.lane.b32.xlu1 %v2779_v10, %s4073_s15  ;;  %3883 = vmatprep.subr.bf16.mxu1 %v3882_v62  ;;  %v3301_v10 = vld [vmem:[%s5024_s7 + $0xc0] sm:$0xff] }
0x1432   :  { %3885 = vmatpush3.bf16.msra.mxu1 %v3882_v62 }
0x149f   :  { %v2783_v6 = vpop.permute.xlu0 %2782 }
0x14a0   :  { %v4867_v31 = vadd.f32 %v2783_v6, %v4644_v51  ;;  %v3302_v6 = vld [vmem:[%s5024_s7 + $0xc8] sm:$0xff] }
0x14a2   :  { %v2790_v21 = vsel %vm151_vm1, %v4867_v31, 0.0 }
0x14a3   :  { %2791 = vadd.xlane.f32.xlu0 %v2790_v21  ;;  %v2785_v3 = vpop.permute.xlu1 %2784  ;;  %v3303_v21 = vld [vmem:[%s5024_s7 + $0xd0] sm:$0xff] }
0x14a4   :  { %v4872_v52 = vadd.f32 %v2785_v3, %v4641_v48  ;;  %v3886_v3 = vpack.c.bf16 %v3302_v6, %v3301_v10 }
0x14a6   :  { %v2793_v19 = vsel %vm151_vm1, %v4872_v52, 0.0  ;;  %3887 = vmatprep.subr.bf16.mxu1 %v3886_v3 }
0x14a7   :  { %2794 = vadd.xlane.f32.xlu1 %v2793_v19  ;;  %v3304_v19 = vld [vmem:[%s5024_s7 + $0xd8] sm:$0xff]  ;;  %3889 = vmatpush3.bf16.msra.mxu1 %v3886_v3  ;;  %v41_v3 = vld [vmem:[%s5017_s2 + $0x20] sm:$0xff] }
0x14b8   :  { %2828 = vrot.lane.b32.xlu1 %v4664_v28, %s4076_s12  ;;  %v3287_v28 = vld [vmem:[%s5023_s6 + $0x20] sm:$0xff] }
0x14b9   :  { %v3862_v16 = vpack.c.bf16 %v3288_v7, %v3287_v28 }
0x14bb   :  { %3863 = vmatprep.subr.bf16.mxu0 %v3862_v16 }
0x14bc   :  { %3865 = vmatpush3.bf16.msra.mxu0 %v3862_v16 }
0x1530   :  { %v2792_v37 = vpop.xlane.xlu0 %2791 }
0x1531   :  { %v2796_v25 = vmul.f32 0.03125, %v2792_v37  ;;  %v3890_v37 = vpack.c.bf16 %v3304_v19, %v3303_v21  ;;  %v42_v19 = vld [vmem:[%s5017_s2 + $0x28] sm:$0xff] }
0x1533   :  { %v2798_v51 = vsub.f32 %v4867_v31, %v2796_v25  ;;  %v3305_v25 = vld [vmem:[%s5024_s7 + $0xe0] sm:$0xff]  ;;  %3891 = vmatprep.subr.bf16.mxu1 %v3890_v37 }
0x1534   :  { %v2795_v32 = vpop.xlane.xlu1 %2794  ;;  %3893 = vmatpush3.bf16.msra.mxu1 %v3890_v37 }
0x1535   :  { %v2797_v24 = vmul.f32 0.03125, %v2795_v32  ;;  %v2800_v30 = vmul.f32 %v2798_v51, %v2798_v51 }
0x1537   :  { %v2799_v34 = vsub.f32 %v4872_v52, %v2797_v24  ;;  %v2802_v61 = vsel %vm151_vm1, %v2800_v30, 0.0  ;;  %v3307_v24 = vld [vmem:[%s5024_s7 + $0xf0] sm:$0xff]  ;;  %v3308_v30 = vld [vmem:[%s5024_s7 + $0xf8] sm:$0xff] }
0x1538   :  { %2803 = vadd.xlane.f32.xlu0 %v2802_v61  ;;  %v2829_v13 = vpop.permute.xlu1 %2828  ;;  %v2844_v61 = vrot.slane %v4657_v49, %v262_v11 }
0x1539   :  { %v2801_v48 = vmul.f32 %v2799_v34, %v2799_v34 }
0x153b   :  { %v2805_v41 = vsel %vm151_vm1, %v2801_v48, 0.0 }
0x153c   :  { %2806 = vadd.xlane.f32.xlu0 %v2805_v41 }
0x1552   :  { %2830 = vrot.lane.b32.xlu0 %v4661_v12, %s4076_s12  ;;  %v3866_v12 = vpack.c.bf16 %v3290_v4, %v3289_v59 }
0x1554   :  { %3867 = vmatprep.subr.bf16.mxu0 %v3866_v12 }
0x1555   :  { %3869 = vmatpush3.bf16.msra.mxu0 %v3866_v12 }
0x15c5   :  { %v2804_v44 = vpop.xlane.xlu0 %2803 }
0x15c6   :  { %v2808_v2 = vmul.f32 0.03125, %v2804_v44 }
0x15c8   :  { %v2810_v26 = vadd.f32 1e-05, %v2808_v2 }
0x15c9   :  { %v2807_v60 = vpop.xlane.xlu0 %2806 }
0x15ca   :  { %4057 = vrsqrt.f32 %v2810_v26  ;;  %v2809_v43 = vmul.f32 0.03125, %v2807_v60 }
0x15cc   :  { %v2811_v36 = vadd.f32 1e-05, %v2809_v43 }
0x15cd   :  { %v2831_v50 = vpop.permute.xlu0 %2830 }
0x15ce   :  { %4059 = vrsqrt.f32 %v2811_v36 }
0x15d4   :  { %v4058_v14 = vpop.eup %4057 }
0x15d5   :  { %v2814_v35 = vmul.f32 %v4058_v14, %v2798_v51  ;;  %v3306_v51 = vld [vmem:[%s5024_s7 + $0xe8] sm:$0xff] }
0x15d6   :  { %v3894_v32 = vpack.c.bf16 %v3306_v51, %v3305_v25 }
0x15d7   :  { %v2820_v0 = vmul.f32 %v2819_v15, %v2814_v35 }
0x15d8   :  { %v4060_v22 = vpop.eup %4059  ;;  %3895 = vmatprep.subr.bf16.mxu1 %v3894_v32 }
0x15d9   :  { %v2815_v56 = vmul.f32 %v4060_v22, %v2799_v34  ;;  %v2824_v18 = vmul.f32 %v4905_v58, %v2820_v0  ;;  %v3898_v34 = vpack.c.bf16 %v3308_v30, %v3307_v24  ;;  %3897 = vmatpush3.bf16.msra.mxu1 %v3894_v32 }
0x15db   :  { %v2821_v53 = vmul.f32 %v2819_v15, %v2815_v56  ;;  %v2834_v63 = vadd.f32 %v2829_v13, %v2824_v18  ;;  %3899 = vmatprep.subr.bf16.mxu1 %v3898_v34  ;;  %v3309_v56 = vld [vmem:[%s5020_s1 + $0x20] ss:$0 sm:$0xff] }
0x15dd   :  { %v2825_v9 = vmul.f32 %v4912_v40, %v2821_v53  ;;  %3641 = vmatprep.mubr.msk.f32.mxu0 %vm151_vm1, %v2834_v63  ;;  %3901 = vmatpush3.bf16.msra.mxu1 %v3898_v34 }
0x15df   :  { %v2835_v5 = vadd.f32 %v2831_v50, %v2825_v9 }
0x15e1   :  { %3642 = vmatmul.mubr.msk.f32.vlgmr.msra.gmra.mrb[34].mxu0 %vm151_vm1, %v2835_v5 }
0x16b4   :  { %v3643_v48 = vpop.f32.mrb[34].mxu0 }
0x16b5   :  { %v2923_v41 = vadd.f32 %v3643_v48, %v2844_v61  ;;  %v2917_v28 = vpop.f32.mrb[35].mxu0 }
0x16b6   :  { %v2918_v7 = vadd.f32 %v2917_v28, %v2844_v61  ;;  %v4072_v61 = vld [vmem:[%s5020_s1] sm:$0xff] }
0x16b7   :  { %v2927_v16 = vmul.f32 %v2923_v41, %v2923_v41  ;;  %v3089_v48 = vrot.slane %v4072_v61, %v1406_v29  ;;  %v3115_v23 = vrot.slane %v4072_v61, %v4220_v47 }
0x16b8   :  { %v2926_v59 = vmul.f32 %v2918_v7, %v2918_v7 }
0x16b9   :  { %v2929_v4 = vmul.f32 %v2927_v16, %v2923_v41 }
0x16ba   :  { %v2928_v12 = vmul.f32 %v2926_v59, %v2918_v7 }
0x16bb   :  { %v2931_v44 = vmul.f32 0.044715, %v2929_v4 }
0x16bc   :  { %v2930_v2 = vmul.f32 0.044715, %v2928_v12 }
0x16bd   :  { %v2933_v26 = vadd.f32 %v2931_v44, %v2923_v41 }
0x16be   :  { %v2932_v60 = vadd.f32 %v2930_v2, %v2918_v7 }
0x16bf   :  { %v2935_v43 = vmul.f32 0.7978846, %v2933_v26 }
0x16c0   :  { %v2934_v36 = vmul.f32 0.7978846, %v2932_v60 }
0x16c1   :  { %4061 = vtanh.f32 %v2935_v43 }
0x16c2   :  { %4063 = vtanh.f32 %v2934_v36 }
0x16cb   :  { %v4062_v39 = vpop.eup %4061 }
0x16cc   :  { %v4064_v15 = vpop.eup %4063  ;;  %v2939_v14 = vadd.f32 1.0, %v4062_v39 }
0x16cd   :  { %v2938_v11 = vadd.f32 1.0, %v4064_v15 }
0x16ce   :  { %v2941_v49 = vmul.f32 0.5, %v2939_v14 }
0x16cf   :  { %v2940_v35 = vmul.f32 0.5, %v2938_v11 }
0x16d0   :  { %v2943_v22 = vmul.f32 %v2941_v49, %v2923_v41 }
0x16d1   :  { %v2942_v0 = vmul.f32 %v2940_v35, %v2918_v7 }
0x16d3   :  { %3676 = vmatprep.mubr.f32.mxu1 %v2942_v0 }
0x16d4   :  { %3677 = vmatmul.mubr.f32.vlgmr.msra.gmra.mrb[12].mxu1 %v2943_v22 }
0x17a7   :  { %v3678_v18 = vpop.f32.mrb[12].mxu1 }
0x17a8   :  { %v3031_v13 = vpop.f32.mrb[13].mxu1  ;;  %v3037_v63 = vadd.f32 %v3678_v18, %v3309_v56 }
0x17a9   :  { %v3032_v53 = vadd.f32 %v3309_v56, %v3031_v13 }
0x17ab   :  { %3042 = vrot.lane.b32.xlu1 %v3032_v53, %s4076_s12 }
0x17af   :  { %3044 = vrot.lane.b32.xlu1 %v3037_v63, %s4076_s12 }
0x181d   :  { %v3043_v9 = vpop.permute.xlu1 %3042 }
0x181e   :  { %v3048_v50 = vmul.f32 %v3043_v9, %v4899_v42 }
0x1820   :  { %3052 = vrot.lane.b32.xlu0 %v3048_v50, %s4075_s17 }
0x1821   :  { %v3045_v5 = vpop.permute.xlu1 %3044 }
0x1822   :  { %v3049_v1 = vmul.f32 %v3045_v5, %v4908_v8 }
0x1824   :  { %3054 = vrot.lane.b32.xlu1 %v3049_v1, %s4075_s17 }
0x1892   :  { %v3053_v17 = vpop.permute.xlu0 %3052 }
0x1893   :  { %v3058_v27 = vadd.f32 %v3053_v17, %v4867_v31 }
0x1895   :  { %v3060_v33 = vsel %vm151_vm1, %v3058_v27, 0.0 }
0x1896   :  { %3061 = vadd.xlane.f32.xlu0 %v3060_v33  ;;  %v3055_v55 = vpop.permute.xlu1 %3054 }
0x1897   :  { %v3059_v20 = vadd.f32 %v3055_v55, %v4872_v52 }
0x1899   :  { %v3063_v54 = vsel %vm151_vm1, %v3059_v20, 0.0 }
0x189a   :  { %3064 = vadd.xlane.f32.xlu1 %v3063_v54 }
0x18ab   :  { %3094 = vrot.lane.b32.xlu1 %v4905_v58, %s4076_s12  ;;  %v40_v58 = vld [vmem:[%s5017_s2 + $0x18] sm:$0xff] }
0x18af   :  { %3104 = vrot.lane.b32.xlu1 %v4899_v42, %s4073_s15  ;;  %v39_v42 = vld [vmem:[%s5017_s2 + $0x10] sm:$0xff] }
0x18b3   :  { %3106 = vrot.lane.b32.xlu1 %v4908_v8, %s4073_s15  ;;  %v3902_v8 = vpack.c.bf16 %v40_v58, %v39_v42 }
0x18b5   :  { %3903 = vmatprep.subr.bf16.mxu0 %v3902_v8 }
0x18b6   :  { %3905 = vmatpush3.bf16.msra.mxu0 %v3902_v8 }
0x1923   :  { %v3062_v45 = vpop.xlane.xlu0 %3061 }
0x1924   :  { %v3066_v31 = vmul.f32 0.03125, %v3062_v45 }
0x1926   :  { %v3068_v46 = vsub.f32 %v3058_v27, %v3066_v31 }
0x1927   :  { %v3065_v38 = vpop.xlane.xlu1 %3064 }
0x1928   :  { %v3067_v57 = vmul.f32 0.03125, %v3065_v38  ;;  %v3070_v62 = vmul.f32 %v3068_v46, %v3068_v46 }
0x192a   :  { %v3069_v10 = vsub.f32 %v3059_v20, %v3067_v57  ;;  %v3072_v52 = vsel %vm151_vm1, %v3070_v62, 0.0 }
0x192b   :  { %3073 = vadd.xlane.f32.xlu0 %v3072_v52  ;;  %v3095_v34 = vpop.permute.xlu1 %3094 }
0x192c   :  { %v3071_v6 = vmul.f32 %v3069_v10, %v3069_v10 }
0x192e   :  { %v3075_v21 = vsel %vm151_vm1, %v3071_v6, 0.0 }
0x192f   :  { %3076 = vadd.xlane.f32.xlu0 %v3075_v21  ;;  %v3105_v59 = vpop.permute.xlu1 %3104 }
0x1933   :  { %v3107_v43 = vpop.permute.xlu1 %3106 }
0x1945   :  { %3096 = vrot.lane.b32.xlu0 %v4912_v40, %s4076_s12  ;;  %v3906_v40 = vpack.c.bf16 %v42_v19, %v41_v3 }
0x1947   :  { %3907 = vmatprep.subr.bf16.mxu0 %v3906_v40 }
0x1948   :  { %3909 = vmatpush3.bf16.msra.mxu0 %v3906_v40 }
0x19b8   :  { %v3074_v37 = vpop.xlane.xlu0 %3073 }
0x19b9   :  { %v3078_v25 = vmul.f32 0.03125, %v3074_v37 }
0x19bb   :  { %v3080_v51 = vadd.f32 1e-05, %v3078_v25 }
0x19bc   :  { %v3077_v32 = vpop.xlane.xlu0 %3076 }
0x19bd   :  { %4065 = vrsqrt.f32 %v3080_v51  ;;  %v3079_v24 = vmul.f32 0.03125, %v3077_v32 }
0x19bf   :  { %v3081_v30 = vadd.f32 1e-05, %v3079_v24 }
0x19c0   :  { %v3097_v26 = vpop.permute.xlu0 %3096 }
0x19c1   :  { %4067 = vrsqrt.f32 %v3081_v30 }
0x19c7   :  { %v4066_v41 = vpop.eup %4065 }
0x19c8   :  { %v3084_v28 = vmul.f32 %v4066_v41, %v3068_v46 }
0x19ca   :  { %v3090_v7 = vmul.f32 %v3089_v48, %v3084_v28 }
0x19cb   :  { %v4068_v16 = vpop.eup %4067 }
0x19cc   :  { %v3085_v4 = vmul.f32 %v4068_v16, %v3069_v10  ;;  %v3100_v12 = vmul.f32 %v3095_v34, %v3090_v7 }
0x19ce   :  { %v3091_v44 = vmul.f32 %v3089_v48, %v3085_v4  ;;  %v3110_v2 = vadd.f32 %v3105_v59, %v3100_v12 }
0x19d0   :  { %v3101_v60 = vmul.f32 %v3097_v26, %v3091_v44  ;;  %3687 = vmatprep.mubr.msk.f32.mxu0 %vm151_vm1, %v3110_v2 }
0x19d2   :  { %v3111_v36 = vadd.f32 %v3107_v43, %v3101_v60 }
0x19d4   :  { %3688 = vmatmul.mubr.msk.f32.vlgmr.msra.gmra.mrb[36].mxu0 %vm151_vm1, %v3111_v36 }
0x1aa7   :  { %v3689_v29 = vpop.f32.mrb[36].mxu0 }
0x1aa8   :  { %v3194_v39 = vadd.f32 %v3689_v29, %v3115_v23  ;;  %v3188_v15 = vpop.f32.mrb[37].mxu0 }
0x1aa9   :  { %v3189_v14 = vadd.f32 %v3188_v15, %v3115_v23 }
0x1aaa   :  { %3198 = vst [vmem:[%s5025_s8 + $0x8] sm:$0xff] %v3194_v39 }
0x1aab   :  { %3197 = vst [vmem:[%s5025_s8] sm:$0xff] %v3189_v14 }

</bundles_post_ra>
